<compile_context>
chip_gen: v7x
topology: tpu7x:2x2x1
jax: 0.10.0
libtpu: 0.0.40
codegen_flags: <defaults>
</compile_context>

<pallas_src>
import jax
import jax.numpy as jnp
from jax.experimental import pallas as pl
from jax.experimental.pallas import tpu as pltpu

_VMEM_LIMIT_BYTES = 32 * 1024 * 1024   # safe on v5e/v6e/v7x
_SMALL_BYPASS_BYTES = 1 << 20          # below this, plain XLA broadcast-add wins


# ------------------------------------------------------------ tile sizing ---
def _tile_bytes_target() -> int:
    """Per-tile byte target, generation-aware.

    ~4 MiB on v7x (amortize ~0.35us/step against ~3.2 TB/s HBM), ~2 MiB on
    v5e/v6e where measurements show no gain past 1-2 MiB tiles.
    """
    try:
        info = pltpu.get_tpu_info()
        version = str(getattr(info, "chip_version", "")).lower()
        if "7" in version:
            return 4 << 20
    except Exception:
        pass
    return 2 << 20


def _divisors(n):
    out = set()
    i = 1
    while i * i <= n:
        if n % i == 0:
            out.add(i)
            out.add(n // i)
        i += 1
    return sorted(out)


def _pick_tile(dim, align, max_tile):
    """Largest tile <= max_tile along `dim`.

    Preference order: (a) the full dim, (b) an `align`-multiple that divides
    `dim` exactly (no ragged edge blocks / masked stores), (c) the largest
    `align`-multiple <= max_tile (ragged edge; Pallas pads).
    """
    max_tile = max(1, max_tile)
    if dim <= max_tile:
        return dim
    cap = max(align, (max_tile // align) * align)
    best = 0
    for d in _divisors(dim):
        if d % align == 0 and d <= cap and d > best:
            best = d
    chosen = best if best > 0 else cap
    return min(chosen, dim)


# ---------------------------------------------------------------- kernel ----
def _add_bias_kernel(x_ref, b_ref, o_ref):
    # In-kernel dtype promotion (free VPU cast) + broadcast add.
    # The op is HBM-bandwidth bound; compute here never binds.
    o_ref[...] = x_ref[...].astype(o_ref.dtype) + b_ref[...]


# ---------------------------------------------------------------- 2D path ---
def add_bias_2d(x, bias_row, out_dtype):
    N, F = x.shape
    itemsize = max(jnp.dtype(x.dtype).itemsize, jnp.dtype(out_dtype).itemsize)
    max_elems = max(1, _tile_bytes_target() // itemsize)

    tile_f = _pick_tile(F, 128, max_elems)                   # lane-dense, divisor-aligned
    tile_n = _pick_tile(N, 8, max(1, max_elems // tile_f))   # sublane-aligned

    # v7x megacore: make sure there are >= 2 parallel grid steps when feasible.
    if pl.cdiv(F, tile_f) * pl.cdiv(N, tile_n) < 2 and N >= 16:
        tile_n = _pick_tile(N, 8, max(8, N // 2))

    # Features outer, rows inner: the bias block index only depends on the
    # outer axis, so its tiny tile is not re-DMA'd every inner step.
    grid = (pl.cdiv(F, tile_f), pl.cdiv(N, tile_n))

    return pl.pallas_call(
        _add_bias_kernel,
        out_shape=jax.ShapeDtypeStruct((N, F), out_dtype),
        grid=grid,
        in_specs=[
            pl.BlockSpec((tile_n, tile_f), lambda j, i: (i, j)),
            pl.BlockSpec((1, tile_f), lambda j, i: (0, j)),   # VMEM-resident bias
        ],
        out_specs=pl.BlockSpec((tile_n, tile_f), lambda j, i: (i, j)),
        compiler_params=pltpu.CompilerParams(
            dimension_semantics=("parallel", "parallel"),
            vmem_limit_bytes=_VMEM_LIMIT_BYTES,
        ),
    )(x, bias_row)


# ---------------------------------------------------------------- 4D path ---
def add_bias_4d(x, bias_chan, out_dtype):
    N, C, H, W = x.shape
    itemsize = max(jnp.dtype(x.dtype).itemsize, jnp.dtype(out_dtype).itemsize)
    max_elems = max(1, _tile_bytes_target() // itemsize)

    # Keep x in its native NCHW layout (no wrapper reshape -> no relayout copy).
    # Trailing (H, W) block dims are full-extent (satisfies the (8,128) rule for
    # any H/W) unless a single plane blows the budget, in which case H is tiled
    # in sublane multiples.
    tile_h = H if H * W <= max_elems else _pick_tile(H, 8, max(1, max_elems // W))
    tile_c = _pick_tile(C, 1, max(1, max_elems // (tile_h * W)))
    tile_n = _pick_tile(N, 1, max(1, max_elems // (tile_c * tile_h * W)))

    # v7x megacore: >= 2 grid steps along some parallel axis when feasible.
    if pl.cdiv(C, tile_c) * pl.cdiv(N, tile_n) * pl.cdiv(H, tile_h) < 2:
        if N >= 2:
            tile_n = _pick_tile(N, 1, max(1, N // 2))
        elif C >= 2:
            tile_c = _pick_tile(C, 1, max(1, C // 2))

    # Channels outer so the bias block index is constant across inner steps.
    grid = (pl.cdiv(C, tile_c), pl.cdiv(N, tile_n), pl.cdiv(H, tile_h))
    bias4 = bias_chan.reshape(1, C, 1, 1)

    return pl.pallas_call(
        _add_bias_kernel,
        out_shape=jax.ShapeDtypeStruct((N, C, H, W), out_dtype),
        grid=grid,
        in_specs=[
            pl.BlockSpec((tile_n, tile_c, tile_h, W), lambda c, i, h: (i, c, h, 0)),
            pl.BlockSpec((1, tile_c, 1, 1), lambda c, i, h: (0, c, 0, 0)),
        ],
        out_specs=pl.BlockSpec((tile_n, tile_c, tile_h, W), lambda c, i, h: (i, c, h, 0)),
        compiler_params=pltpu.CompilerParams(
            dimension_semantics=("parallel", "parallel", "parallel"),
            vmem_limit_bytes=_VMEM_LIMIT_BYTES,
        ),
    )(x, bias4)


# ---------------------------------------------------------------- module ----
class AddBias:
    """JAX/Pallas port of pt-ppo AddBias (forward only)."""

    def __init__(self, bias):
        # mimic nn.Parameter(bias.unsqueeze(1)) -> stored as (F, 1)
        self._bias = jnp.asarray(bias).reshape(-1, 1)

    def __call__(self, x):
        b = self._bias.reshape(-1)  # (F,)
        out_dtype = jnp.promote_types(x.dtype, b.dtype)

        if x.ndim == 2:
            bcast_shape = (1, b.shape[0])
        elif x.ndim == 4:
            bcast_shape = (1, b.shape[0], 1, 1)
        else:
            raise ValueError(f"AddBias expects 2D or 4D input, got {x.ndim}D")

        nbytes = x.size * max(jnp.dtype(x.dtype).itemsize,
                              jnp.dtype(out_dtype).itemsize)
        if nbytes < _SMALL_BYPASS_BYTES:
            # Launch overhead dominates for tiny tensors; XLA's fused
            # broadcast-add already hits roofline here.
            return (x + b.reshape(bcast_shape)).astype(out_dtype)

        b = b.astype(out_dtype)  # bias is tiny; wrapper cast is free
        if x.ndim == 2:
            return add_bias_2d(x, b.reshape(1, -1), out_dtype)
        return add_bias_4d(x, b, out_dtype)


# ---------------------------------------------------------------- demo ------
if __name__ == "__main__":
    key = jax.random.PRNGKey(0)
    k_b, k_x4s, k_x2s, k_x2l, k_x4l, k_bl, k_xm = jax.random.split(key, 7)

    # -- small shapes typical of the module: fast-path broadcast add ----------
    C = 4
    bias = jax.random.normal(k_b, (C,), dtype=jnp.float32)
    module = AddBias(bias)

    x4 = jax.random.normal(k_x4s, (2, C, 16, 16), dtype=jnp.float32)
    y4 = jax.block_until_ready(module(x4))
    assert y4.shape == x4.shape and y4.dtype == x4.dtype
    assert jnp.allclose(y4, x4 + bias.reshape(1, C, 1, 1), atol=1e-6)

    x2 = jax.random.normal(k_x2s, (2, C), dtype=jnp.float32)
    y2 = jax.block_until_ready(module(x2))
    assert jnp.allclose(y2, x2 + bias.reshape(1, C), atol=1e-6)

    # -- 2D Pallas path: divisor-aligned tiles, >= 2 parallel grid steps ------
    Fl = 1280
    bias_l = jax.random.normal(k_bl, (Fl,), dtype=jnp.float32)
    module_l = AddBias(bias_l)
    x2l = jax.random.normal(k_x2l, (640, Fl), dtype=jnp.float32)
    y2l = jax.block_until_ready(module_l(x2l))
    assert y2l.shape == x2l.shape and y2l.dtype == x2l.dtype
    assert jnp.allclose(y2l, x2l + bias_l.reshape(1, Fl), atol=1e-6)

    # -- 2D Pallas path, mixed dtype: promotion happens inside the kernel -----
    x2m = jax.random.normal(k_xm, (640, Fl), dtype=jnp.float32).astype(jnp.bfloat16)
    y2m = jax.block_until_ready(module_l(x2m))
    assert y2m.dtype == jnp.float32
    assert jnp.allclose(y2m, x2m.astype(jnp.float32) + bias_l.reshape(1, Fl), atol=1e-6)

    # -- 4D Pallas path: native NCHW, channel tiling + batch split ------------
    C4 = 8
    bias4 = jax.random.normal(k_b, (C4,), dtype=jnp.float32)
    module4 = AddBias(bias4)
    x4l = jax.random.normal(k_x4l, (16, C4, 64, 64), dtype=jnp.float32)
    y4l = jax.block_until_ready(module4(x4l))
    assert y4l.shape == x4l.shape and y4l.dtype == x4l.dtype
    assert jnp.allclose(y4l, x4l + bias4.reshape(1, C4, 1, 1), atol=1e-6)

    print("KERNEL_OK")
</pallas_src>

<mosaic_0001>
module attributes {stable_mosaic.version = 11 : i64} {
  func.func @_add_bias_kernel(%arg0: i32, %arg1: i32, %arg2: memref<320x1280xf32, #tpu.memory_space<vmem>>, %arg3: memref<1x1280xf32, #tpu.memory_space<vmem>>, %arg4: memref<320x1280xf32, #tpu.memory_space<vmem>>) attributes {dimension_semantics = [#tpu.dimension_semantics<parallel>, #tpu.dimension_semantics<parallel>], iteration_bounds = array<i64: 1, 2>, scalar_prefetch = 0 : i64, scratch_operands = 0 : i64, tpu.core_type = #tpu.core_type<tc>, window_params = [{transform_indices = @transform_0, window_bounds = array<i64: 320, 1280>}, {transform_indices = @transform_1, window_bounds = array<i64: 1, 1280>}, {transform_indices = @transform_2, window_bounds = array<i64: 320, 1280>}]} {
    %c0 = arith.constant 0 : index
    %c0_0 = arith.constant 0 : index
    %0 = vector.load %arg2[%c0, %c0_0] : memref<320x1280xf32, #tpu.memory_space<vmem>>, vector<320x1280xf32>
    %c0_1 = arith.constant 0 : index
    %c0_2 = arith.constant 0 : index
    %1 = vector.load %arg3[%c0_1, %c0_2] : memref<1x1280xf32, #tpu.memory_space<vmem>>, vector<1x1280xf32>
    %2 = vector.broadcast %1 : vector<1x1280xf32> to vector<320x1280xf32>
    %3 = arith.addf %0, %2 : vector<320x1280xf32>
    %c0_3 = arith.constant 0 : index
    %c0_4 = arith.constant 0 : index
    %4 = vector.load %arg4[%c0_3, %c0_4] : memref<320x1280xf32, #tpu.memory_space<vmem>>, vector<320x1280xf32>
    tpu.vector_store %arg4[%c0_3, %c0_4], %3 {strides = array<i32>} : memref<320x1280xf32, #tpu.memory_space<vmem>>, vector<320x1280xf32>,
    return
  }
  func.func @transform_0(%arg0: i32, %arg1: i32) -> (i32, i32) {
    %c0_i32 = arith.constant 0 : i32
    return %arg1, %arg0 : i32, i32
  }
  func.func @transform_1(%arg0: i32, %arg1: i32) -> (i32, i32) {
    %c0_i32 = arith.constant 0 : i32
    %c0_i32_0 = arith.constant 0 : i32
    return %c0_i32, %arg0 : i32, i32
  }
  func.func @transform_2(%arg0: i32, %arg1: i32) -> (i32, i32) {
    %c0_i32 = arith.constant 0 : i32
    return %arg1, %arg0 : i32, i32
  }
}

</mosaic_0001>

<bundles_post_ra>
// kernel: tpu_custom_call.1
= control target key start
LH: loop header
LB: loop body
LE: loop exit
PB: predicated region body
PF: predicated region fallthrough
CT: control target
= control target key end

     0   :  { %7 = vsyncpa [#allocation3], 0  ;;  %s3293_s0 = inlined_call_operand.hbm [shape: f32[640,1280], index: 0, kind: input, shape index: {}]   ;;  %s3294_s1 = inlined_call_operand.hbm [shape: f32[1,1280], index: 1, kind: input, shape index: {}]   ;;  %s3295_s2 = inlined_call_operand.hbm [shape: f32[640,1280], index: 2, kind: output, shape index: {}]  }
   0x1   :  { %9 = vsyncpa [#allocation3 + $0x1], 0 }
   0x2   :  { %10 = vsyncpa [#allocation6], 0 }
   0x3   :  { %11 = vsyncpa [#allocation4], 0 }
   0x4   :  { %13 = vsyncpa [#allocation4 + $0x1], 0  ;;  %s1839_s9 = smov 0   ;;  %s1841_s10 = smov 0  }
   0x5   :  { %s1843_s11 = smov 0   ;;  %s1845_s12 = smov 0  }
   0x6   :  { %s1847_s13 = smov 0   ;;  %s1849_s14 = smov 0  }
   0x7 LB: > { %s1577_s15 = sadd.s32 4294967295, %s1815_s14   ;;  %s1578_s16 = sadd.s32 4294967294, %s1815_s14   ;;  %s1815_s14 = sphi %s1849_s14, %s19_s14   ;;  %s1811_s13 = sphi %s1847_s13, %s3323_s13   ;;  %s1807_s12 = sphi %s1845_s12, %s3322_s12   ;;  %s1803_s11 = sphi %s1843_s11, %s3321_s11   ;;  %s1799_s10 = sphi %s1841_s10, %s3320_s10   ;;  %s1795_s9 = sphi %s1839_s9, %s3319_s9  }
   0x8   : > { %s40_s17 = sadd.s32 1, %s1803_s11  ;;  %p47_p0 = scmp.ne.s32.totalorder %s1803_s11, %s1799_s10 }
   0x9   : > { %p48_p1 = scmp.eq.s32.totalorder %s1815_s14, 0  ;;  %p53_p2 = scmp.ne.s32.totalorder %s1799_s10, %s1795_s9 }
   0xa   : > { %p1877_p3 = scmp.eq.s32.totalorder %s1577_s15, 0  ;;  %p105_p4 = scmp.eq.s32.totalorder %s1577_s15, 1 }
   0xb   : > { %p1881_p5 = por %p48_p1, %p47_p0  ;;  %p111_p6 = scmp.eq.s32.totalorder %s1578_s16, 1 }
   0xc   : > { %s3302_s18 = scalar_select %p1877_p3, 1, 0 }
   0xd   : > { %p1887_p7 = por %p1877_p3, %p53_p2  ;;  %p1891_p8 = por %p105_p4, %p47_p0 }
   0xe   : > { %p1895_p9 = por %p111_p6, %p53_p2  ;;  %p1579_p10 = scmp.ge.s32.totalorder %s1815_s14, 1 }
   0xf   : > { %s3304_s20 = scalar_select %p1887_p7, 1, 0 }
  0x10   : > { %s3305_s21 = scalar_select %p1891_p8, 1, 0 }
  0x11   : > { %s3306_s22 = scalar_select %p1895_p9, 1, 0 }
  0x12   : > { %p118_p11 = scmp.lt.s32.totalorder %s1815_s14, 3  ;;  %s1817_s24 = smov [#allocation5]  }
  0x13   : > { %s134_s25 = sshll.u32 %s1817_s24, 4  ;;  %p1613_p1 = scmp.lt.s32.totalorder %s1815_s14, 2  ;;  %s135_s25 = int_to_ptr.vmem [resolvable:$true] %s134_s25 }
  0x14   : > { %p1902_p13 = pnand %p1579_p10, %p118_p11  ;;  %s28_s28 = sadd.s32 1, %s1811_s13 }
  0x15   : > { %p1911_p4 = pnand %p1613_p1, %p1881_p5  ;;  %p1922_p6 = scmp.ge.s32.totalorder %s28_s28, 2 }
  0x16   : > { %s3307_s23 = scalar_select %p1902_p13, 1, 0 }
  0x17   : > { %p1600_p0 = pneg %p1902_p13  ;;  %s145_s30 = sand.u32 1, %s1803_s11  }
  0x18   : > { %s3308_s26 = scalar_select %p1911_p4, 1, 0 }
  0x19   : > { %p1917_p2 = pnand %p1600_p0, %p1877_p3  ;;  %s1671_s5 = scalar_lea.hbm %s3294_s1, 160 }
  0x1a   : > { %s3310_s29 = scalar_select %p1922_p6, 1, 0 }
  0x1b   : > { %p1672_p5 = scmp.ne.s32.totalorder %s3294_s1, %s1671_s5  ;;  %p1673_p10 = pneg %p1917_p2 }
  0x1c   : > { %p1678_p0 = scmp.lt.u32.totalorder %s1671_s5, %s3294_s1 }
  0x1d   : > { %p1674_p11 = pnand %p1673_p10, %p1672_p5 }
  0x1f   : > { %p1675_p1 = pneg %p1674_p11 }
  0x21   : > { %p1680_p12 = pnand %p1678_p0, %p1675_p1 }
  0x23   : > { %1683 = shalt.err (!%p1680_p12)
}
  0x24   : > { %s1684_s16 = scalar_lea.vmem %s135_s25, 160  ;;  %p1692_p7 = scmp.lt.s32.totalorder %s135_s25, %s135_s25 }
  0x25   : > { %p1685_p9 = scmp.ne.s32.totalorder %s135_s25, %s1684_s16  ;;  %p1693_p13 = scmp.lt.s32.totalorder %s1684_s16, %s1684_s16 }
  0x27   : > { %p1687_p8 = pnand %p1685_p9, %p1673_p10  ;;  %p1694_p4 = por %p1693_p13, %p1692_p7 }
  0x29   : > { %p1688_p3 = pneg %p1687_p8 }
  0x2b   : > { %p1695_p6 = pnand %p1694_p4, %p1688_p3 }
  0x2d   : > { %1698 = shalt.err (!%p1695_p6)
}
  0x2e   : > { %1603 = dma.hbm_to_vmem [thread:$0]  (!%p1917_p2), %s3294_s1, 160, %s135_s25, [#allocation6]  }
  0x2f   : > { %p3311_p9 = scmp.ne.s32.totalorder %s3310_s29, 0  ;;  %s1588_s3 = smul.u32 3200, %s145_s30 }
  0x30   : > { %s1614_s5 = smul.u32 51200, %s1811_s13  ;;  %s1962_s25 = scalar_lea.sflag [#allocation3], %s145_s30 }
  0x31   : > { %s3325_s28 = smov (%p3311_p9, %s28_s28), 0  ;;  %s149_s27 = scalar_lea.vmem [#allocation2], %s1588_s3 }
  0x32   : > { %s35_s4 = ssub.s32 %s1811_s13, %s3325_s28  ;;  %s159_s6 = sshll.u32 %s149_s27, 4  ;;  %s1960_s6 = int_to_ptr.vmem [resolvable:$true] %s159_s6 }
  0x33   : > { %p38_p3 = scmp.eq.s32.totalorder %s35_s4, 0  ;;  %s1958_s16 = scalar_lea.hbm %s3293_s0, %s1614_s5 }
  0x34   : > { %s1699_s29 = scalar_lea.hbm %s1958_s16, 51200  ;;  %p3312_p8 = scmp.ne.s32.totalorder %s3308_s26, 0 }
  0x35   : > { %s1953_s7 = scalar_select %p38_p3, %s1803_s11, %s40_s17  }
  0x36   : > { %p1700_p7 = scmp.ne.s32.totalorder %s1958_s16, %s1699_s29  ;;  %p1701_p12 = pneg %p3312_p8 }
  0x37   : > { %s1704_s24 = scalar_lea.hbm %s3293_s0, 102400  ;;  %p1705_p2 = scmp.lt.u32.totalorder %s1958_s16, %s3293_s0 }
  0x38   : > { %p1702_p13 = pnand %p1701_p12, %p1700_p7  ;;  %p1706_p6 = scmp.lt.u32.totalorder %s1704_s24, %s1699_s29 }
  0x39   : > { %p1708_p10 = scmp.lt.u32.totalorder %s1699_s29, %s1958_s16 }
  0x3a   : > { %p1703_p4 = pneg %p1702_p13  ;;  %p1707_p5 = por %p1706_p6, %p1705_p2 }
  0x3c   : > { %p1709_p11 = por %p1708_p10, %p1707_p5 }
  0x3e   : > { %p1710_p1 = pnand %p1709_p11, %p1703_p4 }
  0x40   : > { %1713 = shalt.err (!%p1710_p1)
}
  0x41   : > { %s1714_s30 = scalar_lea.vmem %s1960_s6, 51200  ;;  %s1818_s5 = smov [#allocation2]  }
  0x42   : > { %p1715_p0 = scmp.ne.s32.totalorder %s1960_s6, %s1714_s30  ;;  %s1719_s27 = sshll.u32 %s1818_s5, 4  ;;  %s1720_s27 = int_to_ptr.vmem [resolvable:$false] %s1719_s27 }
  0x43   : > { %s1721_s8 = scalar_lea.vmem %s1720_s27, 102400  ;;  %p1722_p7 = scmp.lt.s32.totalorder %s1960_s6, %s1720_s27 }
  0x44   : > { %p1717_p9 = pnand %p1715_p0, %p1701_p12  ;;  %p1723_p13 = scmp.lt.s32.totalorder %s1721_s8, %s1714_s30 }
  0x46   : > { %p1718_p3 = pneg %p1717_p9  ;;  %p1724_p2 = por %p1723_p13, %p1722_p7 }
  0x48   : > { %p1725_p6 = pnand %p1724_p2, %p1718_p3 }
  0x4a   : > { %1728 = shalt.err (!%p1725_p6)
}
  0x4b   : > { %s1819_s15 = smov 1280   ;;  %s1820_s29 = smov 80  }
  0x4c   : > { %1607 = dma.hbm_to_vmem [thread:$0]  (!%p3312_p8), %s1958_s16, 51200, %s1960_s6, %s1962_s25, %s1819_s15, %s1819_s15, %s1820_s29  }
  0x4d   : > { %p3313_p12 = scmp.ne.s32.totalorder %s3307_s23, 0 }
  0x4e   : > { %s1993_s17 = sand.u32 (!%p3313_p12), 1, %s1799_s10   ;;  %p3314_p4 = scmp.ne.s32.totalorder (!%p3313_p12), %s3304_s20, 0 }
  0x4f   : > { %171 = sbr.rel (%p3313_p12) target bundleno = 314 (0x13a), region = 28  ;;  %s174_s24 = scalar_lea.sflag (!%p3313_p12), [#allocation3], %s1993_s17 }
  0x50   : > { %s1590_s19 = smul.u32 (!%p3313_p12), 3200, %s1993_s17 }
  0x52   : > { %s1999_s3 = scalar_lea.vmem (!%p3313_p12), [#allocation2], %s1590_s19 }
  0x56   : > { %1782 = dma.done.wait (%p3314_p4), %s174_s24, 51200  }
  0x57   : > { %1784 = vsyncadd (%p3314_p4), %s174_s24, 4294916096  ;;  %p3315_p8 = scmp.ne.s32.totalorder %s3302_s18, 0 }
  0x59   : > { %1786 = dma.done.wait (%p3315_p8), [#allocation6], 160  }
  0x5a   : > { %1788 = vsyncadd (%p3315_p8), [#allocation6], 4294967136  ;;  %v611_v0 = vlaneseq  ;;  %v207_v10 = vld [vmem:[%s1999_s3] sm:$0xff]  ;;  %v208_v12 = vld [vmem:[%s1999_s3 + $0x8] sm:$0xff]  ;;  %s2048_s18 = scalar_lea.vmem [#allocation7], %s1590_s19  ;;  %s1616_s20 = smul.u32 51200, %s1807_s12 }
  0x5b   : > { %v607_v11 = vld [vmem:[#allocation5] sm:$0xff]  ;;  %v209_v15 = vld [vmem:[%s1999_s3 + $0x10] sm:$0xff]  ;;  %v210_v17 = vld [vmem:[%s1999_s3 + $0x18] sm:$0xff]  ;;  %s1478_s23 = sshll.u32 %s2048_s18, 4  ;;  %s1462_s12 = scalar_lea.sflag [#allocation4], %s1993_s17  ;;  %s3232_s23 = int_to_ptr.vmem [resolvable:$true] %s1478_s23 }
  0x5c   : > { %v612_v1 = vshrl.u32 %v611_v0, 7  ;;  %v211_v19 = vld [vmem:[%s1999_s3 + $0x20] sm:$0xff]  ;;  %v212_v21 = vld [vmem:[%s1999_s3 + $0x28] sm:$0xff]  ;;  %v213_v23 = vld [vmem:[%s1999_s3 + $0x30] sm:$0xff]  ;;  %s3228_s16 = scalar_lea.hbm %s3295_s2, %s1616_s20  ;;  %s1729_s25 = scalar_lea.vmem %s3232_s23, 51200 }
  0x5d   : > { %v214_v25 = vld [vmem:[%s1999_s3 + $0x38] sm:$0xff]  ;;  %v215_v31 = vld [vmem:[%s1999_s3 + $0x40] sm:$0xff]  ;;  %v608_v32 = vld [vmem:[#allocation5 + $0x8] sm:$0x3]  ;;  %p1730_p5 = scmp.ne.s32.totalorder %s3232_s23, %s1729_s25  ;;  %p3316_p10 = scmp.ne.s32.totalorder %s3305_s21, 0 }
  0x5e   : > { %v613_v2 = vsub.s32 0, %v612_v1  ;;  %v617_v3 = vsub.s32 1, %v612_v1  ;;  %v621_v4 = vsub.s32 2, %v612_v1  ;;  %v625_v5 = vsub.s32 3, %v612_v1  ;;  %v216_v33 = vld [vmem:[%s1999_s3 + $0x48] sm:$0xff]  ;;  %v217_v38 = vld [vmem:[%s1999_s3 + $0x50] sm:$0xff] }
  0x5f   : > { %v629_v6 = vsub.s32 4, %v612_v1  ;;  %v633_v7 = vsub.s32 5, %v612_v1  ;;  %v637_v8 = vsub.s32 6, %v612_v1  ;;  %v641_v9 = vsub.s32 7, %v612_v1  ;;  %v218_v39 = vld [vmem:[%s1999_s3 + $0x58] sm:$0xff]  ;;  %v219_v40 = vld [vmem:[%s1999_s3 + $0x60] sm:$0xff]  ;;  %p1731_p11 = pnand %p1730_p5, %p3316_p10 }
  0x60   : > { %v2011_v13 = vrot.slane %v607_v11, %v613_v2  ;;  %v2013_v14 = vrot.slane %v607_v11, %v617_v3  ;;  %v2016_v16 = vrot.slane %v607_v11, %v621_v4  ;;  %v2019_v18 = vrot.slane %v607_v11, %v625_v5  ;;  %v220_v45 = vld [vmem:[%s1999_s3 + $0x68] sm:$0xff]  ;;  %v221_v46 = vld [vmem:[%s1999_s3 + $0x70] sm:$0xff]  ;;  %v222_v47 = vld [vmem:[%s1999_s3 + $0x78] sm:$0xff]  ;;  %s1821_s4 = smov [#allocation7]  }
  0x61   : > { %v2022_v20 = vrot.slane %v607_v11, %v629_v6  ;;  %v2025_v22 = vrot.slane %v607_v11, %v633_v7  ;;  %v2028_v24 = vrot.slane %v607_v11, %v637_v8  ;;  %v2031_v26 = vrot.slane %v607_v11, %v641_v9  ;;  %v223_v52 = vld [vmem:[%s1999_s3 + $0x80] sm:$0xff]  ;;  %v224_v53 = vld [vmem:[%s1999_s3 + $0x88] sm:$0xff]  ;;  %v225_v54 = vld [vmem:[%s1999_s3 + $0x90] sm:$0xff]  ;;  %p1732_p1 = pneg %p1731_p11  ;;  %s1733_s30 = sshll.u32 %s1821_s4, 4  ;;  %s1734_s30 = int_to_ptr.vmem [resolvable:$false] %s1733_s30 }
  0x62   : > { %v661_v27 = vadd.f32 %v2011_v13, %v207_v10  ;;  %v662_v28 = vadd.f32 %v2013_v14, %v208_v12  ;;  %v663_v29 = vadd.f32 %v2016_v16, %v209_v15  ;;  %v664_v30 = vadd.f32 %v2019_v18, %v210_v17  ;;  %v226_v59 = vld [vmem:[%s1999_s3 + $0x98] sm:$0xff]  ;;  %v227_v60 = vld [vmem:[%s1999_s3 + $0xa0] sm:$0xff]  ;;  %v228_v61 = vld [vmem:[%s1999_s3 + $0xa8] sm:$0xff]  ;;  %s1735_s5 = scalar_lea.vmem %s1734_s30, 102400  ;;  %p1736_p0 = scmp.lt.s32.totalorder %s3232_s23, %s1734_s30 }
  0x63   : > { %v665_v34 = vadd.f32 %v2022_v20, %v211_v19  ;;  %v666_v35 = vadd.f32 %v2025_v22, %v212_v21  ;;  %v667_v36 = vadd.f32 %v2028_v24, %v213_v23  ;;  %v668_v37 = vadd.f32 %v2031_v26, %v214_v25  ;;  %v231_v4 = vld [vmem:[%s1999_s3 + $0xc0] sm:$0xff]  ;;  %v232_v8 = vld [vmem:[%s1999_s3 + $0xc8] sm:$0xff]  ;;  %v233_v9 = vld [vmem:[%s1999_s3 + $0xd0] sm:$0xff]  ;;  %p1737_p9 = scmp.lt.s32.totalorder %s1735_s5, %s1729_s25 }
  0x64   : > { %1061 = vst [vmem:[%s2048_s18] sm:$0xff] %v661_v27  ;;  %1062 = vst [vmem:[%s2048_s18 + $0x8] sm:$0xff] %v662_v28  ;;  %v2054_v41 = vrot.slane %v608_v32, %v613_v2  ;;  %v2056_v42 = vrot.slane %v608_v32, %v617_v3  ;;  %v671_v43 = vadd.f32 %v2011_v13, %v217_v38  ;;  %v229_v2 = vld [vmem:[%s1999_s3 + $0xb0] sm:$0xff]  ;;  %v230_v3 = vld [vmem:[%s1999_s3 + $0xb8] sm:$0xff] }
  0x65   : > { %1063 = vst [vmem:[%s2048_s18 + $0x10] sm:$0xff] %v663_v29  ;;  %1064 = vst [vmem:[%s2048_s18 + $0x18] sm:$0xff] %v664_v30  ;;  %v672_v44 = vadd.f32 %v2013_v14, %v218_v39  ;;  %v673_v48 = vadd.f32 %v2016_v16, %v219_v40  ;;  %v674_v49 = vadd.f32 %v2019_v18, %v220_v45  ;;  %v234_v10 = vld [vmem:[%s1999_s3 + $0xd8] sm:$0xff]  ;;  %v235_v17 = vld [vmem:[%s1999_s3 + $0xe0] sm:$0xff]  ;;  %p1738_p3 = por %p1737_p9, %p1736_p0 }
  0x66   : > { %1065 = vst [vmem:[%s2048_s18 + $0x20] sm:$0xff] %v665_v34  ;;  %1066 = vst [vmem:[%s2048_s18 + $0x28] sm:$0xff] %v666_v35  ;;  %v675_v50 = vadd.f32 %v2022_v20, %v221_v46  ;;  %v676_v51 = vadd.f32 %v2025_v22, %v222_v47  ;;  %v669_v55 = vadd.f32 %v2054_v41, %v215_v31  ;;  %v236_v19 = vld [vmem:[%s1999_s3 + $0xe8] sm:$0xff]  ;;  %v237_v21 = vld [vmem:[%s1999_s3 + $0xf0] sm:$0xff] }
  0x67   : > { %1067 = vst [vmem:[%s2048_s18 + $0x30] sm:$0xff] %v667_v36  ;;  %1068 = vst [vmem:[%s2048_s18 + $0x38] sm:$0xff] %v668_v37  ;;  %v670_v56 = vadd.f32 %v2056_v42, %v216_v33  ;;  %v677_v57 = vadd.f32 %v2028_v24, %v223_v52  ;;  %v678_v58 = vadd.f32 %v2031_v26, %v224_v53  ;;  %v238_v28 = vld [vmem:[%s1999_s3 + $0xf8] sm:$0xff]  ;;  %v239_v29 = vld [vmem:[%s1999_s3 + $0x100] sm:$0xff]  ;;  %p1739_p7 = pnand %p1738_p3, %p1732_p1 }
  0x68   : > { %1071 = vst [vmem:[%s2048_s18 + $0x50] sm:$0xff] %v671_v43  ;;  %1072 = vst [vmem:[%s2048_s18 + $0x58] sm:$0xff] %v672_v44  ;;  %v679_v62 = vadd.f32 %v2054_v41, %v225_v54  ;;  %v680_v63 = vadd.f32 %v2056_v42, %v226_v59  ;;  %v681_v0 = vadd.f32 %v2011_v13, %v227_v60  ;;  %v240_v30 = vld [vmem:[%s1999_s3 + $0x108] sm:$0xff]  ;;  %v241_v34 = vld [vmem:[%s1999_s3 + $0x110] sm:$0xff] }
  0x69   : > { %1073 = vst [vmem:[%s2048_s18 + $0x60] sm:$0xff] %v673_v48  ;;  %1074 = vst [vmem:[%s2048_s18 + $0x68] sm:$0xff] %v674_v49  ;;  %v682_v1 = vadd.f32 %v2013_v14, %v228_v61  ;;  %v683_v5 = vadd.f32 %v2016_v16, %v229_v2  ;;  %v684_v6 = vadd.f32 %v2019_v18, %v230_v3  ;;  %v242_v35 = vld [vmem:[%s1999_s3 + $0x118] sm:$0xff]  ;;  %v243_v36 = vld [vmem:[%s1999_s3 + $0x120] sm:$0xff] }
  0x6a   : > { %1075 = vst [vmem:[%s2048_s18 + $0x70] sm:$0xff] %v675_v50  ;;  %1076 = vst [vmem:[%s2048_s18 + $0x78] sm:$0xff] %v676_v51  ;;  %v685_v7 = vadd.f32 %v2022_v20, %v231_v4  ;;  %v686_v11 = vadd.f32 %v2025_v22, %v232_v8  ;;  %v687_v12 = vadd.f32 %v2028_v24, %v233_v9  ;;  %v244_v40 = vld [vmem:[%s1999_s3 + $0x128] sm:$0xff]  ;;  %v245_v43 = vld [vmem:[%s1999_s3 + $0x130] sm:$0xff] }
  0x6b   : > { %1069 = vst [vmem:[%s2048_s18 + $0x40] sm:$0xff] %v669_v55  ;;  %1070 = vst [vmem:[%s2048_s18 + $0x48] sm:$0xff] %v670_v56  ;;  %v688_v15 = vadd.f32 %v2031_v26, %v234_v10  ;;  %v689_v23 = vadd.f32 %v2054_v41, %v235_v17  ;;  %v690_v25 = vadd.f32 %v2056_v42, %v236_v19  ;;  %v246_v44 = vld [vmem:[%s1999_s3 + $0x138] sm:$0xff]  ;;  %v247_v48 = vld [vmem:[%s1999_s3 + $0x140] sm:$0xff] }
  0x6c   : > { %1077 = vst [vmem:[%s2048_s18 + $0x80] sm:$0xff] %v677_v57  ;;  %1078 = vst [vmem:[%s2048_s18 + $0x88] sm:$0xff] %v678_v58  ;;  %v691_v27 = vadd.f32 %v2011_v13, %v237_v21  ;;  %v692_v31 = vadd.f32 %v2013_v14, %v238_v28  ;;  %v693_v32 = vadd.f32 %v2016_v16, %v239_v29  ;;  %v248_v49 = vld [vmem:[%s1999_s3 + $0x148] sm:$0xff]  ;;  %v249_v50 = vld [vmem:[%s1999_s3 + $0x150] sm:$0xff] }
  0x6d   : > { %1079 = vst [vmem:[%s2048_s18 + $0x90] sm:$0xff] %v679_v62  ;;  %1080 = vst [vmem:[%s2048_s18 + $0x98] sm:$0xff] %v680_v63  ;;  %v694_v33 = vadd.f32 %v2019_v18, %v240_v30  ;;  %v695_v37 = vadd.f32 %v2022_v20, %v241_v34  ;;  %v696_v38 = vadd.f32 %v2025_v22, %v242_v35  ;;  %v250_v54 = vld [vmem:[%s1999_s3 + $0x158] sm:$0xff]  ;;  %v251_v55 = vld [vmem:[%s1999_s3 + $0x160] sm:$0xff] }
  0x6e   : > { %1081 = vst [vmem:[%s2048_s18 + $0xa0] sm:$0xff] %v681_v0  ;;  %1082 = vst [vmem:[%s2048_s18 + $0xa8] sm:$0xff] %v682_v1  ;;  %v697_v39 = vadd.f32 %v2028_v24, %v243_v36  ;;  %v698_v45 = vadd.f32 %v2031_v26, %v244_v40  ;;  %v699_v46 = vadd.f32 %v2054_v41, %v245_v43  ;;  %v252_v56 = vld [vmem:[%s1999_s3 + $0x168] sm:$0xff]  ;;  %v253_v60 = vld [vmem:[%s1999_s3 + $0x170] sm:$0xff] }
  0x6f   : > { %1083 = vst [vmem:[%s2048_s18 + $0xb0] sm:$0xff] %v683_v5  ;;  %1084 = vst [vmem:[%s2048_s18 + $0xb8] sm:$0xff] %v684_v6  ;;  %v700_v47 = vadd.f32 %v2056_v42, %v246_v44  ;;  %v701_v51 = vadd.f32 %v2011_v13, %v247_v48  ;;  %v702_v52 = vadd.f32 %v2013_v14, %v248_v49  ;;  %v254_v61 = vld [vmem:[%s1999_s3 + $0x178] sm:$0xff]  ;;  %v255_v62 = vld [vmem:[%s1999_s3 + $0x180] sm:$0xff] }
  0x70   : > { %1085 = vst [vmem:[%s2048_s18 + $0xc0] sm:$0xff] %v685_v7  ;;  %1086 = vst [vmem:[%s2048_s18 + $0xc8] sm:$0xff] %v686_v11  ;;  %v703_v53 = vadd.f32 %v2016_v16, %v249_v50  ;;  %v704_v57 = vadd.f32 %v2019_v18, %v250_v54  ;;  %v705_v58 = vadd.f32 %v2022_v20, %v251_v55  ;;  %v256_v2 = vld [vmem:[%s1999_s3 + $0x188] sm:$0xff]  ;;  %v257_v3 = vld [vmem:[%s1999_s3 + $0x190] sm:$0xff] }
  0x71   : > { %1087 = vst [vmem:[%s2048_s18 + $0xd0] sm:$0xff] %v687_v12  ;;  %1088 = vst [vmem:[%s2048_s18 + $0xd8] sm:$0xff] %v688_v15  ;;  %v706_v59 = vadd.f32 %v2025_v22, %v252_v56  ;;  %v707_v63 = vadd.f32 %v2028_v24, %v253_v60  ;;  %v708_v0 = vadd.f32 %v2031_v26, %v254_v61  ;;  %v258_v4 = vld [vmem:[%s1999_s3 + $0x198] sm:$0xff]  ;;  %v259_v8 = vld [vmem:[%s1999_s3 + $0x1a0] sm:$0xff] }
  0x72   : > { %1089 = vst [vmem:[%s2048_s18 + $0xe0] sm:$0xff] %v689_v23  ;;  %1090 = vst [vmem:[%s2048_s18 + $0xe8] sm:$0xff] %v690_v25  ;;  %v709_v1 = vadd.f32 %v2054_v41, %v255_v62  ;;  %v710_v5 = vadd.f32 %v2056_v42, %v256_v2  ;;  %v711_v6 = vadd.f32 %v2011_v13, %v257_v3  ;;  %v260_v9 = vld [vmem:[%s1999_s3 + $0x1a8] sm:$0xff]  ;;  %v261_v10 = vld [vmem:[%s1999_s3 + $0x1b0] sm:$0xff] }
  0x73   : > { %1091 = vst [vmem:[%s2048_s18 + $0xf0] sm:$0xff] %v691_v27  ;;  %1092 = vst [vmem:[%s2048_s18 + $0xf8] sm:$0xff] %v692_v31  ;;  %v712_v7 = vadd.f32 %v2013_v14, %v258_v4  ;;  %v713_v11 = vadd.f32 %v2016_v16, %v259_v8  ;;  %v714_v12 = vadd.f32 %v2019_v18, %v260_v9  ;;  %v262_v17 = vld [vmem:[%s1999_s3 + $0x1b8] sm:$0xff]  ;;  %v263_v19 = vld [vmem:[%s1999_s3 + $0x1c0] sm:$0xff] }
  0x74   : > { %1093 = vst [vmem:[%s2048_s18 + $0x100] sm:$0xff] %v693_v32  ;;  %1094 = vst [vmem:[%s2048_s18 + $0x108] sm:$0xff] %v694_v33  ;;  %v715_v15 = vadd.f32 %v2022_v20, %v261_v10  ;;  %v264_v21 = vld [vmem:[%s1999_s3 + $0x1c8] sm:$0xff]  ;;  %v716_v23 = vadd.f32 %v2025_v22, %v262_v17  ;;  %v717_v25 = vadd.f32 %v2028_v24, %v263_v19  ;;  %v265_v28 = vld [vmem:[%s1999_s3 + $0x1d0] sm:$0xff] }
  0x75   : > { %1095 = vst [vmem:[%s2048_s18 + $0x110] sm:$0xff] %v695_v37  ;;  %1096 = vst [vmem:[%s2048_s18 + $0x118] sm:$0xff] %v696_v38  ;;  %v718_v27 = vadd.f32 %v2031_v26, %v264_v21  ;;  %v266_v29 = vld [vmem:[%s1999_s3 + $0x1d8] sm:$0xff]  ;;  %v267_v30 = vld [vmem:[%s1999_s3 + $0x1e0] sm:$0xff]  ;;  %v719_v31 = vadd.f32 %v2054_v41, %v265_v28 }
  0x76   : > { %1097 = vst [vmem:[%s2048_s18 + $0x120] sm:$0xff] %v697_v39  ;;  %1098 = vst [vmem:[%s2048_s18 + $0x128] sm:$0xff] %v698_v45  ;;  %v720_v32 = vadd.f32 %v2056_v42, %v266_v29  ;;  %v721_v33 = vadd.f32 %v2011_v13, %v267_v30  ;;  %v268_v34 = vld [vmem:[%s1999_s3 + $0x1e8] sm:$0xff]  ;;  %v269_v35 = vld [vmem:[%s1999_s3 + $0x1f0] sm:$0xff] }
  0x77   : > { %1099 = vst [vmem:[%s2048_s18 + $0x130] sm:$0xff] %v699_v46  ;;  %1100 = vst [vmem:[%s2048_s18 + $0x138] sm:$0xff] %v700_v47  ;;  %v270_v36 = vld [vmem:[%s1999_s3 + $0x1f8] sm:$0xff]  ;;  %v722_v37 = vadd.f32 %v2013_v14, %v268_v34  ;;  %v723_v38 = vadd.f32 %v2016_v16, %v269_v35  ;;  %v271_v40 = vld [vmem:[%s1999_s3 + $0x200] sm:$0xff] }
  0x78   : > { %1101 = vst [vmem:[%s2048_s18 + $0x140] sm:$0xff] %v701_v51  ;;  %1102 = vst [vmem:[%s2048_s18 + $0x148] sm:$0xff] %v702_v52  ;;  %v724_v39 = vadd.f32 %v2019_v18, %v270_v36  ;;  %v272_v43 = vld [vmem:[%s1999_s3 + $0x208] sm:$0xff]  ;;  %v273_v44 = vld [vmem:[%s1999_s3 + $0x210] sm:$0xff]  ;;  %v725_v45 = vadd.f32 %v2022_v20, %v271_v40 }
  0x79   : > { %1103 = vst [vmem:[%s2048_s18 + $0x150] sm:$0xff] %v703_v53  ;;  %1104 = vst [vmem:[%s2048_s18 + $0x158] sm:$0xff] %v704_v57  ;;  %v726_v46 = vadd.f32 %v2025_v22, %v272_v43  ;;  %v727_v47 = vadd.f32 %v2028_v24, %v273_v44  ;;  %v274_v48 = vld [vmem:[%s1999_s3 + $0x218] sm:$0xff]  ;;  %v275_v49 = vld [vmem:[%s1999_s3 + $0x220] sm:$0xff] }
  0x7a   : > { %1105 = vst [vmem:[%s2048_s18 + $0x160] sm:$0xff] %v705_v58  ;;  %1106 = vst [vmem:[%s2048_s18 + $0x168] sm:$0xff] %v706_v59  ;;  %v276_v50 = vld [vmem:[%s1999_s3 + $0x228] sm:$0xff]  ;;  %v728_v51 = vadd.f32 %v2031_v26, %v274_v48  ;;  %v729_v52 = vadd.f32 %v2054_v41, %v275_v49  ;;  %v277_v54 = vld [vmem:[%s1999_s3 + $0x230] sm:$0xff] }
  0x7b   : > { %1107 = vst [vmem:[%s2048_s18 + $0x170] sm:$0xff] %v707_v63  ;;  %1108 = vst [vmem:[%s2048_s18 + $0x178] sm:$0xff] %v708_v0  ;;  %v730_v53 = vadd.f32 %v2056_v42, %v276_v50  ;;  %v278_v55 = vld [vmem:[%s1999_s3 + $0x238] sm:$0xff]  ;;  %v279_v56 = vld [vmem:[%s1999_s3 + $0x240] sm:$0xff]  ;;  %v731_v57 = vadd.f32 %v2011_v13, %v277_v54 }
  0x7c   : > { %1109 = vst [vmem:[%s2048_s18 + $0x180] sm:$0xff] %v709_v1  ;;  %1110 = vst [vmem:[%s2048_s18 + $0x188] sm:$0xff] %v710_v5  ;;  %v732_v58 = vadd.f32 %v2013_v14, %v278_v55  ;;  %v733_v59 = vadd.f32 %v2016_v16, %v279_v56  ;;  %v280_v60 = vld [vmem:[%s1999_s3 + $0x248] sm:$0xff]  ;;  %v281_v61 = vld [vmem:[%s1999_s3 + $0x250] sm:$0xff] }
  0x7d   : > { %1111 = vst [vmem:[%s2048_s18 + $0x190] sm:$0xff] %v711_v6  ;;  %1112 = vst [vmem:[%s2048_s18 + $0x198] sm:$0xff] %v712_v7  ;;  %v282_v62 = vld [vmem:[%s1999_s3 + $0x258] sm:$0xff]  ;;  %v734_v63 = vadd.f32 %v2019_v18, %v280_v60  ;;  %v735_v0 = vadd.f32 %v2022_v20, %v281_v61  ;;  %v283_v2 = vld [vmem:[%s1999_s3 + $0x260] sm:$0xff] }
  0x7e   : > { %1113 = vst [vmem:[%s2048_s18 + $0x1a0] sm:$0xff] %v713_v11  ;;  %1114 = vst [vmem:[%s2048_s18 + $0x1a8] sm:$0xff] %v714_v12  ;;  %v736_v1 = vadd.f32 %v2025_v22, %v282_v62  ;;  %v284_v3 = vld [vmem:[%s1999_s3 + $0x268] sm:$0xff]  ;;  %v285_v4 = vld [vmem:[%s1999_s3 + $0x270] sm:$0xff]  ;;  %v737_v5 = vadd.f32 %v2028_v24, %v283_v2 }
  0x7f   : > { %1115 = vst [vmem:[%s2048_s18 + $0x1b0] sm:$0xff] %v715_v15  ;;  %1116 = vst [vmem:[%s2048_s18 + $0x1b8] sm:$0xff] %v716_v23  ;;  %v738_v6 = vadd.f32 %v2031_v26, %v284_v3  ;;  %v739_v7 = vadd.f32 %v2054_v41, %v285_v4  ;;  %v286_v8 = vld [vmem:[%s1999_s3 + $0x278] sm:$0xff]  ;;  %v287_v9 = vld [vmem:[%s1999_s3 + $0x280] sm:$0xff] }
  0x80   : > { %1117 = vst [vmem:[%s2048_s18 + $0x1c0] sm:$0xff] %v717_v25  ;;  %1118 = vst [vmem:[%s2048_s18 + $0x1c8] sm:$0xff] %v718_v27  ;;  %v288_v10 = vld [vmem:[%s1999_s3 + $0x288] sm:$0xff]  ;;  %v740_v11 = vadd.f32 %v2056_v42, %v286_v8  ;;  %v741_v12 = vadd.f32 %v2011_v13, %v287_v9  ;;  %v289_v17 = vld [vmem:[%s1999_s3 + $0x290] sm:$0xff] }
  0x81   : > { %1119 = vst [vmem:[%s2048_s18 + $0x1d0] sm:$0xff] %v719_v31  ;;  %1120 = vst [vmem:[%s2048_s18 + $0x1d8] sm:$0xff] %v720_v32  ;;  %v742_v15 = vadd.f32 %v2013_v14, %v288_v10  ;;  %v290_v19 = vld [vmem:[%s1999_s3 + $0x298] sm:$0xff]  ;;  %v291_v21 = vld [vmem:[%s1999_s3 + $0x2a0] sm:$0xff]  ;;  %v743_v23 = vadd.f32 %v2016_v16, %v289_v17 }
  0x82   : > { %1121 = vst [vmem:[%s2048_s18 + $0x1e0] sm:$0xff] %v721_v33  ;;  %1122 = vst [vmem:[%s2048_s18 + $0x1e8] sm:$0xff] %v722_v37  ;;  %v744_v25 = vadd.f32 %v2019_v18, %v290_v19  ;;  %v745_v27 = vadd.f32 %v2022_v20, %v291_v21  ;;  %v292_v28 = vld [vmem:[%s1999_s3 + $0x2a8] sm:$0xff]  ;;  %v293_v29 = vld [vmem:[%s1999_s3 + $0x2b0] sm:$0xff] }
  0x83   : > { %1123 = vst [vmem:[%s2048_s18 + $0x1f0] sm:$0xff] %v723_v38  ;;  %1124 = vst [vmem:[%s2048_s18 + $0x1f8] sm:$0xff] %v724_v39  ;;  %v294_v30 = vld [vmem:[%s1999_s3 + $0x2b8] sm:$0xff]  ;;  %v746_v31 = vadd.f32 %v2025_v22, %v292_v28  ;;  %v747_v32 = vadd.f32 %v2028_v24, %v293_v29  ;;  %v295_v34 = vld [vmem:[%s1999_s3 + $0x2c0] sm:$0xff] }
  0x84   : > { %1125 = vst [vmem:[%s2048_s18 + $0x200] sm:$0xff] %v725_v45  ;;  %1126 = vst [vmem:[%s2048_s18 + $0x208] sm:$0xff] %v726_v46  ;;  %v748_v33 = vadd.f32 %v2031_v26, %v294_v30  ;;  %v296_v35 = vld [vmem:[%s1999_s3 + $0x2c8] sm:$0xff]  ;;  %v297_v36 = vld [vmem:[%s1999_s3 + $0x2d0] sm:$0xff]  ;;  %v749_v37 = vadd.f32 %v2054_v41, %v295_v34 }
  0x85   : > { %1127 = vst [vmem:[%s2048_s18 + $0x210] sm:$0xff] %v727_v47  ;;  %1128 = vst [vmem:[%s2048_s18 + $0x218] sm:$0xff] %v728_v51  ;;  %v750_v38 = vadd.f32 %v2056_v42, %v296_v35  ;;  %v751_v39 = vadd.f32 %v2011_v13, %v297_v36  ;;  %v298_v40 = vld [vmem:[%s1999_s3 + $0x2d8] sm:$0xff]  ;;  %v299_v43 = vld [vmem:[%s1999_s3 + $0x2e0] sm:$0xff] }
  0x86   : > { %1129 = vst [vmem:[%s2048_s18 + $0x220] sm:$0xff] %v729_v52  ;;  %1130 = vst [vmem:[%s2048_s18 + $0x228] sm:$0xff] %v730_v53  ;;  %v300_v44 = vld [vmem:[%s1999_s3 + $0x2e8] sm:$0xff]  ;;  %v752_v45 = vadd.f32 %v2013_v14, %v298_v40  ;;  %v753_v46 = vadd.f32 %v2016_v16, %v299_v43  ;;  %v301_v48 = vld [vmem:[%s1999_s3 + $0x2f0] sm:$0xff] }
  0x87   : > { %1131 = vst [vmem:[%s2048_s18 + $0x230] sm:$0xff] %v731_v57  ;;  %1132 = vst [vmem:[%s2048_s18 + $0x238] sm:$0xff] %v732_v58  ;;  %v754_v47 = vadd.f32 %v2019_v18, %v300_v44  ;;  %v302_v49 = vld [vmem:[%s1999_s3 + $0x2f8] sm:$0xff]  ;;  %v303_v50 = vld [vmem:[%s1999_s3 + $0x300] sm:$0xff]  ;;  %v755_v51 = vadd.f32 %v2022_v20, %v301_v48 }
  0x88   : > { %1133 = vst [vmem:[%s2048_s18 + $0x240] sm:$0xff] %v733_v59  ;;  %1134 = vst [vmem:[%s2048_s18 + $0x248] sm:$0xff] %v734_v63  ;;  %v756_v52 = vadd.f32 %v2025_v22, %v302_v49  ;;  %v757_v53 = vadd.f32 %v2028_v24, %v303_v50  ;;  %v304_v54 = vld [vmem:[%s1999_s3 + $0x308] sm:$0xff]  ;;  %v305_v55 = vld [vmem:[%s1999_s3 + $0x310] sm:$0xff] }
  0x89   : > { %1135 = vst [vmem:[%s2048_s18 + $0x250] sm:$0xff] %v735_v0  ;;  %1136 = vst [vmem:[%s2048_s18 + $0x258] sm:$0xff] %v736_v1  ;;  %v306_v56 = vld [vmem:[%s1999_s3 + $0x318] sm:$0xff]  ;;  %v758_v57 = vadd.f32 %v2031_v26, %v304_v54  ;;  %v759_v58 = vadd.f32 %v2054_v41, %v305_v55  ;;  %v307_v60 = vld [vmem:[%s1999_s3 + $0x320] sm:$0xff] }
  0x8a   : > { %1137 = vst [vmem:[%s2048_s18 + $0x260] sm:$0xff] %v737_v5  ;;  %1138 = vst [vmem:[%s2048_s18 + $0x268] sm:$0xff] %v738_v6  ;;  %v760_v59 = vadd.f32 %v2056_v42, %v306_v56  ;;  %v308_v61 = vld [vmem:[%s1999_s3 + $0x328] sm:$0xff]  ;;  %v309_v62 = vld [vmem:[%s1999_s3 + $0x330] sm:$0xff]  ;;  %v761_v63 = vadd.f32 %v2011_v13, %v307_v60 }
  0x8b   : > { %1139 = vst [vmem:[%s2048_s18 + $0x270] sm:$0xff] %v739_v7  ;;  %1140 = vst [vmem:[%s2048_s18 + $0x278] sm:$0xff] %v740_v11  ;;  %v762_v0 = vadd.f32 %v2013_v14, %v308_v61  ;;  %v763_v1 = vadd.f32 %v2016_v16, %v309_v62  ;;  %v310_v2 = vld [vmem:[%s1999_s3 + $0x338] sm:$0xff]  ;;  %v311_v3 = vld [vmem:[%s1999_s3 + $0x340] sm:$0xff] }
  0x8c   : > { %1141 = vst [vmem:[%s2048_s18 + $0x280] sm:$0xff] %v741_v12  ;;  %1142 = vst [vmem:[%s2048_s18 + $0x288] sm:$0xff] %v742_v15  ;;  %v312_v4 = vld [vmem:[%s1999_s3 + $0x348] sm:$0xff]  ;;  %v764_v5 = vadd.f32 %v2019_v18, %v310_v2  ;;  %v765_v6 = vadd.f32 %v2022_v20, %v311_v3  ;;  %v313_v8 = vld [vmem:[%s1999_s3 + $0x350] sm:$0xff] }
  0x8d   : > { %1143 = vst [vmem:[%s2048_s18 + $0x290] sm:$0xff] %v743_v23  ;;  %1144 = vst [vmem:[%s2048_s18 + $0x298] sm:$0xff] %v744_v25  ;;  %v766_v7 = vadd.f32 %v2025_v22, %v312_v4  ;;  %v314_v9 = vld [vmem:[%s1999_s3 + $0x358] sm:$0xff]  ;;  %v315_v10 = vld [vmem:[%s1999_s3 + $0x360] sm:$0xff]  ;;  %v767_v11 = vadd.f32 %v2028_v24, %v313_v8 }
  0x8e   : > { %1145 = vst [vmem:[%s2048_s18 + $0x2a0] sm:$0xff] %v745_v27  ;;  %1146 = vst [vmem:[%s2048_s18 + $0x2a8] sm:$0xff] %v746_v31  ;;  %v768_v12 = vadd.f32 %v2031_v26, %v314_v9  ;;  %v769_v15 = vadd.f32 %v2054_v41, %v315_v10  ;;  %v316_v17 = vld [vmem:[%s1999_s3 + $0x368] sm:$0xff]  ;;  %v317_v19 = vld [vmem:[%s1999_s3 + $0x370] sm:$0xff] }
  0x8f   : > { %1147 = vst [vmem:[%s2048_s18 + $0x2b0] sm:$0xff] %v747_v32  ;;  %1148 = vst [vmem:[%s2048_s18 + $0x2b8] sm:$0xff] %v748_v33  ;;  %v318_v21 = vld [vmem:[%s1999_s3 + $0x378] sm:$0xff]  ;;  %v770_v23 = vadd.f32 %v2056_v42, %v316_v17  ;;  %v771_v25 = vadd.f32 %v2011_v13, %v317_v19  ;;  %v319_v28 = vld [vmem:[%s1999_s3 + $0x380] sm:$0xff] }
  0x90   : > { %1149 = vst [vmem:[%s2048_s18 + $0x2c0] sm:$0xff] %v749_v37  ;;  %1150 = vst [vmem:[%s2048_s18 + $0x2c8] sm:$0xff] %v750_v38  ;;  %v772_v27 = vadd.f32 %v2013_v14, %v318_v21  ;;  %v320_v29 = vld [vmem:[%s1999_s3 + $0x388] sm:$0xff]  ;;  %v321_v30 = vld [vmem:[%s1999_s3 + $0x390] sm:$0xff]  ;;  %v773_v31 = vadd.f32 %v2016_v16, %v319_v28 }
  0x91   : > { %1151 = vst [vmem:[%s2048_s18 + $0x2d0] sm:$0xff] %v751_v39  ;;  %1152 = vst [vmem:[%s2048_s18 + $0x2d8] sm:$0xff] %v752_v45  ;;  %v774_v32 = vadd.f32 %v2019_v18, %v320_v29  ;;  %v775_v33 = vadd.f32 %v2022_v20, %v321_v30  ;;  %v322_v34 = vld [vmem:[%s1999_s3 + $0x398] sm:$0xff]  ;;  %v323_v35 = vld [vmem:[%s1999_s3 + $0x3a0] sm:$0xff] }
  0x92   : > { %1153 = vst [vmem:[%s2048_s18 + $0x2e0] sm:$0xff] %v753_v46  ;;  %1154 = vst [vmem:[%s2048_s18 + $0x2e8] sm:$0xff] %v754_v47  ;;  %v324_v36 = vld [vmem:[%s1999_s3 + $0x3a8] sm:$0xff]  ;;  %v776_v37 = vadd.f32 %v2025_v22, %v322_v34  ;;  %v777_v38 = vadd.f32 %v2028_v24, %v323_v35  ;;  %v325_v40 = vld [vmem:[%s1999_s3 + $0x3b0] sm:$0xff] }
  0x93   : > { %1155 = vst [vmem:[%s2048_s18 + $0x2f0] sm:$0xff] %v755_v51  ;;  %1156 = vst [vmem:[%s2048_s18 + $0x2f8] sm:$0xff] %v756_v52  ;;  %v778_v39 = vadd.f32 %v2031_v26, %v324_v36  ;;  %v326_v43 = vld [vmem:[%s1999_s3 + $0x3b8] sm:$0xff]  ;;  %v327_v44 = vld [vmem:[%s1999_s3 + $0x3c0] sm:$0xff]  ;;  %v779_v45 = vadd.f32 %v2054_v41, %v325_v40 }
  0x94   : > { %1157 = vst [vmem:[%s2048_s18 + $0x300] sm:$0xff] %v757_v53  ;;  %1158 = vst [vmem:[%s2048_s18 + $0x308] sm:$0xff] %v758_v57  ;;  %v780_v46 = vadd.f32 %v2056_v42, %v326_v43  ;;  %v781_v47 = vadd.f32 %v2011_v13, %v327_v44  ;;  %v328_v48 = vld [vmem:[%s1999_s3 + $0x3c8] sm:$0xff]  ;;  %v329_v49 = vld [vmem:[%s1999_s3 + $0x3d0] sm:$0xff] }
  0x95   : > { %1159 = vst [vmem:[%s2048_s18 + $0x310] sm:$0xff] %v759_v58  ;;  %1160 = vst [vmem:[%s2048_s18 + $0x318] sm:$0xff] %v760_v59  ;;  %v330_v50 = vld [vmem:[%s1999_s3 + $0x3d8] sm:$0xff]  ;;  %v782_v51 = vadd.f32 %v2013_v14, %v328_v48  ;;  %v783_v52 = vadd.f32 %v2016_v16, %v329_v49  ;;  %v331_v54 = vld [vmem:[%s1999_s3 + $0x3e0] sm:$0xff] }
  0x96   : > { %1161 = vst [vmem:[%s2048_s18 + $0x320] sm:$0xff] %v761_v63  ;;  %1162 = vst [vmem:[%s2048_s18 + $0x328] sm:$0xff] %v762_v0  ;;  %v784_v53 = vadd.f32 %v2019_v18, %v330_v50  ;;  %v332_v55 = vld [vmem:[%s1999_s3 + $0x3e8] sm:$0xff]  ;;  %v333_v56 = vld [vmem:[%s1999_s3 + $0x3f0] sm:$0xff]  ;;  %v785_v57 = vadd.f32 %v2022_v20, %v331_v54 }
  0x97   : > { %1163 = vst [vmem:[%s2048_s18 + $0x330] sm:$0xff] %v763_v1  ;;  %1164 = vst [vmem:[%s2048_s18 + $0x338] sm:$0xff] %v764_v5  ;;  %v786_v58 = vadd.f32 %v2025_v22, %v332_v55  ;;  %v787_v59 = vadd.f32 %v2028_v24, %v333_v56  ;;  %v334_v60 = vld [vmem:[%s1999_s3 + $0x3f8] sm:$0xff]  ;;  %v335_v61 = vld [vmem:[%s1999_s3 + $0x400] sm:$0xff] }
  0x98   : > { %1165 = vst [vmem:[%s2048_s18 + $0x340] sm:$0xff] %v765_v6  ;;  %1166 = vst [vmem:[%s2048_s18 + $0x348] sm:$0xff] %v766_v7  ;;  %v336_v62 = vld [vmem:[%s1999_s3 + $0x408] sm:$0xff]  ;;  %v788_v63 = vadd.f32 %v2031_v26, %v334_v60  ;;  %v789_v0 = vadd.f32 %v2054_v41, %v335_v61  ;;  %v337_v2 = vld [vmem:[%s1999_s3 + $0x410] sm:$0xff] }
  0x99   : > { %1167 = vst [vmem:[%s2048_s18 + $0x350] sm:$0xff] %v767_v11  ;;  %1168 = vst [vmem:[%s2048_s18 + $0x358] sm:$0xff] %v768_v12  ;;  %v790_v1 = vadd.f32 %v2056_v42, %v336_v62  ;;  %v338_v3 = vld [vmem:[%s1999_s3 + $0x418] sm:$0xff]  ;;  %v339_v4 = vld [vmem:[%s1999_s3 + $0x420] sm:$0xff]  ;;  %v791_v5 = vadd.f32 %v2011_v13, %v337_v2 }
  0x9a   : > { %1169 = vst [vmem:[%s2048_s18 + $0x360] sm:$0xff] %v769_v15  ;;  %1170 = vst [vmem:[%s2048_s18 + $0x368] sm:$0xff] %v770_v23  ;;  %v792_v6 = vadd.f32 %v2013_v14, %v338_v3  ;;  %v793_v7 = vadd.f32 %v2016_v16, %v339_v4  ;;  %v340_v8 = vld [vmem:[%s1999_s3 + $0x428] sm:$0xff]  ;;  %v341_v9 = vld [vmem:[%s1999_s3 + $0x430] sm:$0xff] }
  0x9b   : > { %1171 = vst [vmem:[%s2048_s18 + $0x370] sm:$0xff] %v771_v25  ;;  %1172 = vst [vmem:[%s2048_s18 + $0x378] sm:$0xff] %v772_v27  ;;  %v342_v10 = vld [vmem:[%s1999_s3 + $0x438] sm:$0xff]  ;;  %v794_v11 = vadd.f32 %v2019_v18, %v340_v8  ;;  %v795_v12 = vadd.f32 %v2022_v20, %v341_v9  ;;  %v343_v17 = vld [vmem:[%s1999_s3 + $0x440] sm:$0xff] }
  0x9c   : > { %1173 = vst [vmem:[%s2048_s18 + $0x380] sm:$0xff] %v773_v31  ;;  %1174 = vst [vmem:[%s2048_s18 + $0x388] sm:$0xff] %v774_v32  ;;  %v796_v15 = vadd.f32 %v2025_v22, %v342_v10  ;;  %v344_v19 = vld [vmem:[%s1999_s3 + $0x448] sm:$0xff]  ;;  %v345_v21 = vld [vmem:[%s1999_s3 + $0x450] sm:$0xff]  ;;  %v797_v23 = vadd.f32 %v2028_v24, %v343_v17 }
  0x9d   : > { %1175 = vst [vmem:[%s2048_s18 + $0x390] sm:$0xff] %v775_v33  ;;  %1176 = vst [vmem:[%s2048_s18 + $0x398] sm:$0xff] %v776_v37  ;;  %v798_v25 = vadd.f32 %v2031_v26, %v344_v19  ;;  %v799_v27 = vadd.f32 %v2054_v41, %v345_v21  ;;  %v346_v28 = vld [vmem:[%s1999_s3 + $0x458] sm:$0xff]  ;;  %v347_v29 = vld [vmem:[%s1999_s3 + $0x460] sm:$0xff] }
  0x9e   : > { %1177 = vst [vmem:[%s2048_s18 + $0x3a0] sm:$0xff] %v777_v38  ;;  %1178 = vst [vmem:[%s2048_s18 + $0x3a8] sm:$0xff] %v778_v39  ;;  %v348_v30 = vld [vmem:[%s1999_s3 + $0x468] sm:$0xff]  ;;  %v800_v31 = vadd.f32 %v2056_v42, %v346_v28  ;;  %v801_v32 = vadd.f32 %v2011_v13, %v347_v29  ;;  %v349_v34 = vld [vmem:[%s1999_s3 + $0x470] sm:$0xff] }
  0x9f   : > { %1179 = vst [vmem:[%s2048_s18 + $0x3b0] sm:$0xff] %v779_v45  ;;  %1180 = vst [vmem:[%s2048_s18 + $0x3b8] sm:$0xff] %v780_v46  ;;  %v802_v33 = vadd.f32 %v2013_v14, %v348_v30  ;;  %v350_v35 = vld [vmem:[%s1999_s3 + $0x478] sm:$0xff]  ;;  %v351_v36 = vld [vmem:[%s1999_s3 + $0x480] sm:$0xff]  ;;  %v803_v37 = vadd.f32 %v2016_v16, %v349_v34 }
  0xa0   : > { %1181 = vst [vmem:[%s2048_s18 + $0x3c0] sm:$0xff] %v781_v47  ;;  %1182 = vst [vmem:[%s2048_s18 + $0x3c8] sm:$0xff] %v782_v51  ;;  %v804_v38 = vadd.f32 %v2019_v18, %v350_v35  ;;  %v805_v39 = vadd.f32 %v2022_v20, %v351_v36  ;;  %v352_v40 = vld [vmem:[%s1999_s3 + $0x488] sm:$0xff]  ;;  %v353_v43 = vld [vmem:[%s1999_s3 + $0x490] sm:$0xff] }
  0xa1   : > { %1183 = vst [vmem:[%s2048_s18 + $0x3d0] sm:$0xff] %v783_v52  ;;  %1184 = vst [vmem:[%s2048_s18 + $0x3d8] sm:$0xff] %v784_v53  ;;  %v354_v44 = vld [vmem:[%s1999_s3 + $0x498] sm:$0xff]  ;;  %v806_v45 = vadd.f32 %v2025_v22, %v352_v40  ;;  %v807_v46 = vadd.f32 %v2028_v24, %v353_v43  ;;  %v355_v48 = vld [vmem:[%s1999_s3 + $0x4a0] sm:$0xff] }
  0xa2   : > { %1185 = vst [vmem:[%s2048_s18 + $0x3e0] sm:$0xff] %v785_v57  ;;  %1186 = vst [vmem:[%s2048_s18 + $0x3e8] sm:$0xff] %v786_v58  ;;  %v808_v47 = vadd.f32 %v2031_v26, %v354_v44  ;;  %v356_v49 = vld [vmem:[%s1999_s3 + $0x4a8] sm:$0xff]  ;;  %v357_v50 = vld [vmem:[%s1999_s3 + $0x4b0] sm:$0xff]  ;;  %v809_v51 = vadd.f32 %v2054_v41, %v355_v48 }
  0xa3   : > { %1187 = vst [vmem:[%s2048_s18 + $0x3f0] sm:$0xff] %v787_v59  ;;  %1188 = vst [vmem:[%s2048_s18 + $0x3f8] sm:$0xff] %v788_v63  ;;  %v810_v52 = vadd.f32 %v2056_v42, %v356_v49  ;;  %v811_v53 = vadd.f32 %v2011_v13, %v357_v50  ;;  %v358_v54 = vld [vmem:[%s1999_s3 + $0x4b8] sm:$0xff]  ;;  %v359_v55 = vld [vmem:[%s1999_s3 + $0x4c0] sm:$0xff] }
  0xa4   : > { %1189 = vst [vmem:[%s2048_s18 + $0x400] sm:$0xff] %v789_v0  ;;  %1190 = vst [vmem:[%s2048_s18 + $0x408] sm:$0xff] %v790_v1  ;;  %v360_v56 = vld [vmem:[%s1999_s3 + $0x4c8] sm:$0xff]  ;;  %v812_v57 = vadd.f32 %v2013_v14, %v358_v54  ;;  %v813_v58 = vadd.f32 %v2016_v16, %v359_v55  ;;  %v361_v60 = vld [vmem:[%s1999_s3 + $0x4d0] sm:$0xff] }
  0xa5   : > { %1191 = vst [vmem:[%s2048_s18 + $0x410] sm:$0xff] %v791_v5  ;;  %1192 = vst [vmem:[%s2048_s18 + $0x418] sm:$0xff] %v792_v6  ;;  %v814_v59 = vadd.f32 %v2019_v18, %v360_v56  ;;  %v362_v61 = vld [vmem:[%s1999_s3 + $0x4d8] sm:$0xff]  ;;  %v363_v62 = vld [vmem:[%s1999_s3 + $0x4e0] sm:$0xff]  ;;  %v815_v63 = vadd.f32 %v2022_v20, %v361_v60 }
  0xa6   : > { %1193 = vst [vmem:[%s2048_s18 + $0x420] sm:$0xff] %v793_v7  ;;  %1194 = vst [vmem:[%s2048_s18 + $0x428] sm:$0xff] %v794_v11  ;;  %v816_v0 = vadd.f32 %v2025_v22, %v362_v61  ;;  %v817_v1 = vadd.f32 %v2028_v24, %v363_v62  ;;  %v364_v2 = vld [vmem:[%s1999_s3 + $0x4e8] sm:$0xff]  ;;  %v365_v3 = vld [vmem:[%s1999_s3 + $0x4f0] sm:$0xff] }
  0xa7   : > { %1195 = vst [vmem:[%s2048_s18 + $0x430] sm:$0xff] %v795_v12  ;;  %1196 = vst [vmem:[%s2048_s18 + $0x438] sm:$0xff] %v796_v15  ;;  %v366_v4 = vld [vmem:[%s1999_s3 + $0x4f8] sm:$0xff]  ;;  %v818_v5 = vadd.f32 %v2031_v26, %v364_v2  ;;  %v819_v6 = vadd.f32 %v2054_v41, %v365_v3  ;;  %v367_v8 = vld [vmem:[%s1999_s3 + $0x500] sm:$0xff] }
  0xa8   : > { %1197 = vst [vmem:[%s2048_s18 + $0x440] sm:$0xff] %v797_v23  ;;  %1198 = vst [vmem:[%s2048_s18 + $0x448] sm:$0xff] %v798_v25  ;;  %v820_v7 = vadd.f32 %v2056_v42, %v366_v4  ;;  %v368_v9 = vld [vmem:[%s1999_s3 + $0x508] sm:$0xff]  ;;  %v369_v10 = vld [vmem:[%s1999_s3 + $0x510] sm:$0xff]  ;;  %v821_v11 = vadd.f32 %v2011_v13, %v367_v8 }
  0xa9   : > { %1199 = vst [vmem:[%s2048_s18 + $0x450] sm:$0xff] %v799_v27  ;;  %1200 = vst [vmem:[%s2048_s18 + $0x458] sm:$0xff] %v800_v31  ;;  %v822_v12 = vadd.f32 %v2013_v14, %v368_v9  ;;  %v823_v15 = vadd.f32 %v2016_v16, %v369_v10  ;;  %v370_v17 = vld [vmem:[%s1999_s3 + $0x518] sm:$0xff]  ;;  %v371_v19 = vld [vmem:[%s1999_s3 + $0x520] sm:$0xff] }
  0xaa   : > { %1201 = vst [vmem:[%s2048_s18 + $0x460] sm:$0xff] %v801_v32  ;;  %1202 = vst [vmem:[%s2048_s18 + $0x468] sm:$0xff] %v802_v33  ;;  %v372_v21 = vld [vmem:[%s1999_s3 + $0x528] sm:$0xff]  ;;  %v824_v23 = vadd.f32 %v2019_v18, %v370_v17  ;;  %v825_v25 = vadd.f32 %v2022_v20, %v371_v19  ;;  %v373_v28 = vld [vmem:[%s1999_s3 + $0x530] sm:$0xff] }
  0xab   : > { %1203 = vst [vmem:[%s2048_s18 + $0x470] sm:$0xff] %v803_v37  ;;  %1204 = vst [vmem:[%s2048_s18 + $0x478] sm:$0xff] %v804_v38  ;;  %v826_v27 = vadd.f32 %v2025_v22, %v372_v21  ;;  %v374_v29 = vld [vmem:[%s1999_s3 + $0x538] sm:$0xff]  ;;  %v375_v30 = vld [vmem:[%s1999_s3 + $0x540] sm:$0xff]  ;;  %v827_v31 = vadd.f32 %v2028_v24, %v373_v28 }
  0xac   : > { %1205 = vst [vmem:[%s2048_s18 + $0x480] sm:$0xff] %v805_v39  ;;  %1206 = vst [vmem:[%s2048_s18 + $0x488] sm:$0xff] %v806_v45  ;;  %v828_v32 = vadd.f32 %v2031_v26, %v374_v29  ;;  %v829_v33 = vadd.f32 %v2054_v41, %v375_v30  ;;  %v376_v34 = vld [vmem:[%s1999_s3 + $0x548] sm:$0xff]  ;;  %v377_v35 = vld [vmem:[%s1999_s3 + $0x550] sm:$0xff] }
  0xad   : > { %1207 = vst [vmem:[%s2048_s18 + $0x490] sm:$0xff] %v807_v46  ;;  %1208 = vst [vmem:[%s2048_s18 + $0x498] sm:$0xff] %v808_v47  ;;  %v378_v36 = vld [vmem:[%s1999_s3 + $0x558] sm:$0xff]  ;;  %v830_v37 = vadd.f32 %v2056_v42, %v376_v34  ;;  %v831_v38 = vadd.f32 %v2011_v13, %v377_v35  ;;  %v379_v40 = vld [vmem:[%s1999_s3 + $0x560] sm:$0xff] }
  0xae   : > { %1209 = vst [vmem:[%s2048_s18 + $0x4a0] sm:$0xff] %v809_v51  ;;  %1210 = vst [vmem:[%s2048_s18 + $0x4a8] sm:$0xff] %v810_v52  ;;  %v832_v39 = vadd.f32 %v2013_v14, %v378_v36  ;;  %v380_v43 = vld [vmem:[%s1999_s3 + $0x568] sm:$0xff]  ;;  %v381_v44 = vld [vmem:[%s1999_s3 + $0x570] sm:$0xff]  ;;  %v833_v45 = vadd.f32 %v2016_v16, %v379_v40 }
  0xaf   : > { %1211 = vst [vmem:[%s2048_s18 + $0x4b0] sm:$0xff] %v811_v53  ;;  %1212 = vst [vmem:[%s2048_s18 + $0x4b8] sm:$0xff] %v812_v57  ;;  %v834_v46 = vadd.f32 %v2019_v18, %v380_v43  ;;  %v835_v47 = vadd.f32 %v2022_v20, %v381_v44  ;;  %v382_v48 = vld [vmem:[%s1999_s3 + $0x578] sm:$0xff]  ;;  %v383_v49 = vld [vmem:[%s1999_s3 + $0x580] sm:$0xff] }
  0xb0   : > { %1213 = vst [vmem:[%s2048_s18 + $0x4c0] sm:$0xff] %v813_v58  ;;  %1214 = vst [vmem:[%s2048_s18 + $0x4c8] sm:$0xff] %v814_v59  ;;  %v384_v50 = vld [vmem:[%s1999_s3 + $0x588] sm:$0xff]  ;;  %v836_v51 = vadd.f32 %v2025_v22, %v382_v48  ;;  %v837_v52 = vadd.f32 %v2028_v24, %v383_v49  ;;  %v385_v54 = vld [vmem:[%s1999_s3 + $0x590] sm:$0xff] }
  0xb1   : > { %1215 = vst [vmem:[%s2048_s18 + $0x4d0] sm:$0xff] %v815_v63  ;;  %1216 = vst [vmem:[%s2048_s18 + $0x4d8] sm:$0xff] %v816_v0  ;;  %v838_v53 = vadd.f32 %v2031_v26, %v384_v50  ;;  %v386_v55 = vld [vmem:[%s1999_s3 + $0x598] sm:$0xff]  ;;  %v387_v56 = vld [vmem:[%s1999_s3 + $0x5a0] sm:$0xff]  ;;  %v839_v57 = vadd.f32 %v2054_v41, %v385_v54 }
  0xb2   : > { %1217 = vst [vmem:[%s2048_s18 + $0x4e0] sm:$0xff] %v817_v1  ;;  %1218 = vst [vmem:[%s2048_s18 + $0x4e8] sm:$0xff] %v818_v5  ;;  %v840_v58 = vadd.f32 %v2056_v42, %v386_v55  ;;  %v841_v59 = vadd.f32 %v2011_v13, %v387_v56  ;;  %v388_v60 = vld [vmem:[%s1999_s3 + $0x5a8] sm:$0xff]  ;;  %v389_v61 = vld [vmem:[%s1999_s3 + $0x5b0] sm:$0xff] }
  0xb3   : > { %1219 = vst [vmem:[%s2048_s18 + $0x4f0] sm:$0xff] %v819_v6  ;;  %1220 = vst [vmem:[%s2048_s18 + $0x4f8] sm:$0xff] %v820_v7  ;;  %v390_v62 = vld [vmem:[%s1999_s3 + $0x5b8] sm:$0xff]  ;;  %v842_v63 = vadd.f32 %v2013_v14, %v388_v60  ;;  %v843_v0 = vadd.f32 %v2016_v16, %v389_v61  ;;  %v391_v2 = vld [vmem:[%s1999_s3 + $0x5c0] sm:$0xff] }
  0xb4   : > { %1221 = vst [vmem:[%s2048_s18 + $0x500] sm:$0xff] %v821_v11  ;;  %1222 = vst [vmem:[%s2048_s18 + $0x508] sm:$0xff] %v822_v12  ;;  %v844_v1 = vadd.f32 %v2019_v18, %v390_v62  ;;  %v392_v3 = vld [vmem:[%s1999_s3 + $0x5c8] sm:$0xff]  ;;  %v393_v4 = vld [vmem:[%s1999_s3 + $0x5d0] sm:$0xff]  ;;  %v845_v5 = vadd.f32 %v2022_v20, %v391_v2 }
  0xb5   : > { %1223 = vst [vmem:[%s2048_s18 + $0x510] sm:$0xff] %v823_v15  ;;  %1224 = vst [vmem:[%s2048_s18 + $0x518] sm:$0xff] %v824_v23  ;;  %v846_v6 = vadd.f32 %v2025_v22, %v392_v3  ;;  %v847_v7 = vadd.f32 %v2028_v24, %v393_v4  ;;  %v394_v8 = vld [vmem:[%s1999_s3 + $0x5d8] sm:$0xff]  ;;  %v395_v9 = vld [vmem:[%s1999_s3 + $0x5e0] sm:$0xff] }
  0xb6   : > { %1225 = vst [vmem:[%s2048_s18 + $0x520] sm:$0xff] %v825_v25  ;;  %1226 = vst [vmem:[%s2048_s18 + $0x528] sm:$0xff] %v826_v27  ;;  %v396_v10 = vld [vmem:[%s1999_s3 + $0x5e8] sm:$0xff]  ;;  %v848_v11 = vadd.f32 %v2031_v26, %v394_v8  ;;  %v849_v12 = vadd.f32 %v2054_v41, %v395_v9  ;;  %v397_v17 = vld [vmem:[%s1999_s3 + $0x5f0] sm:$0xff] }
  0xb7   : > { %1227 = vst [vmem:[%s2048_s18 + $0x530] sm:$0xff] %v827_v31  ;;  %1228 = vst [vmem:[%s2048_s18 + $0x538] sm:$0xff] %v828_v32  ;;  %v850_v15 = vadd.f32 %v2056_v42, %v396_v10  ;;  %v398_v19 = vld [vmem:[%s1999_s3 + $0x5f8] sm:$0xff]  ;;  %v399_v21 = vld [vmem:[%s1999_s3 + $0x600] sm:$0xff]  ;;  %v851_v23 = vadd.f32 %v2011_v13, %v397_v17 }
  0xb8   : > { %1229 = vst [vmem:[%s2048_s18 + $0x540] sm:$0xff] %v829_v33  ;;  %1230 = vst [vmem:[%s2048_s18 + $0x548] sm:$0xff] %v830_v37  ;;  %v852_v25 = vadd.f32 %v2013_v14, %v398_v19  ;;  %v853_v27 = vadd.f32 %v2016_v16, %v399_v21  ;;  %v400_v28 = vld [vmem:[%s1999_s3 + $0x608] sm:$0xff]  ;;  %v401_v29 = vld [vmem:[%s1999_s3 + $0x610] sm:$0xff] }
  0xb9   : > { %1231 = vst [vmem:[%s2048_s18 + $0x550] sm:$0xff] %v831_v38  ;;  %1232 = vst [vmem:[%s2048_s18 + $0x558] sm:$0xff] %v832_v39  ;;  %v402_v30 = vld [vmem:[%s1999_s3 + $0x618] sm:$0xff]  ;;  %v854_v31 = vadd.f32 %v2019_v18, %v400_v28  ;;  %v855_v32 = vadd.f32 %v2022_v20, %v401_v29  ;;  %v403_v34 = vld [vmem:[%s1999_s3 + $0x620] sm:$0xff] }
  0xba   : > { %1233 = vst [vmem:[%s2048_s18 + $0x560] sm:$0xff] %v833_v45  ;;  %1234 = vst [vmem:[%s2048_s18 + $0x568] sm:$0xff] %v834_v46  ;;  %v856_v33 = vadd.f32 %v2025_v22, %v402_v30  ;;  %v404_v35 = vld [vmem:[%s1999_s3 + $0x628] sm:$0xff]  ;;  %v405_v36 = vld [vmem:[%s1999_s3 + $0x630] sm:$0xff]  ;;  %v857_v37 = vadd.f32 %v2028_v24, %v403_v34 }
  0xbb   : > { %1235 = vst [vmem:[%s2048_s18 + $0x570] sm:$0xff] %v835_v47  ;;  %1236 = vst [vmem:[%s2048_s18 + $0x578] sm:$0xff] %v836_v51  ;;  %v858_v38 = vadd.f32 %v2031_v26, %v404_v35  ;;  %v859_v39 = vadd.f32 %v2054_v41, %v405_v36  ;;  %v406_v40 = vld [vmem:[%s1999_s3 + $0x638] sm:$0xff]  ;;  %v407_v43 = vld [vmem:[%s1999_s3 + $0x640] sm:$0xff] }
  0xbc   : > { %1237 = vst [vmem:[%s2048_s18 + $0x580] sm:$0xff] %v837_v52  ;;  %1238 = vst [vmem:[%s2048_s18 + $0x588] sm:$0xff] %v838_v53  ;;  %v408_v44 = vld [vmem:[%s1999_s3 + $0x648] sm:$0xff]  ;;  %v860_v45 = vadd.f32 %v2056_v42, %v406_v40  ;;  %v861_v46 = vadd.f32 %v2011_v13, %v407_v43  ;;  %v409_v48 = vld [vmem:[%s1999_s3 + $0x650] sm:$0xff] }
  0xbd   : > { %1239 = vst [vmem:[%s2048_s18 + $0x590] sm:$0xff] %v839_v57  ;;  %1240 = vst [vmem:[%s2048_s18 + $0x598] sm:$0xff] %v840_v58  ;;  %v862_v47 = vadd.f32 %v2013_v14, %v408_v44  ;;  %v410_v49 = vld [vmem:[%s1999_s3 + $0x658] sm:$0xff]  ;;  %v411_v50 = vld [vmem:[%s1999_s3 + $0x660] sm:$0xff]  ;;  %v863_v51 = vadd.f32 %v2016_v16, %v409_v48 }
  0xbe   : > { %1241 = vst [vmem:[%s2048_s18 + $0x5a0] sm:$0xff] %v841_v59  ;;  %1242 = vst [vmem:[%s2048_s18 + $0x5a8] sm:$0xff] %v842_v63  ;;  %v864_v52 = vadd.f32 %v2019_v18, %v410_v49  ;;  %v865_v53 = vadd.f32 %v2022_v20, %v411_v50  ;;  %v412_v54 = vld [vmem:[%s1999_s3 + $0x668] sm:$0xff]  ;;  %v413_v55 = vld [vmem:[%s1999_s3 + $0x670] sm:$0xff] }
  0xbf   : > { %1243 = vst [vmem:[%s2048_s18 + $0x5b0] sm:$0xff] %v843_v0  ;;  %1244 = vst [vmem:[%s2048_s18 + $0x5b8] sm:$0xff] %v844_v1  ;;  %v414_v56 = vld [vmem:[%s1999_s3 + $0x678] sm:$0xff]  ;;  %v866_v57 = vadd.f32 %v2025_v22, %v412_v54  ;;  %v867_v58 = vadd.f32 %v2028_v24, %v413_v55  ;;  %v415_v60 = vld [vmem:[%s1999_s3 + $0x680] sm:$0xff] }
  0xc0   : > { %1245 = vst [vmem:[%s2048_s18 + $0x5c0] sm:$0xff] %v845_v5  ;;  %1246 = vst [vmem:[%s2048_s18 + $0x5c8] sm:$0xff] %v846_v6  ;;  %v868_v59 = vadd.f32 %v2031_v26, %v414_v56  ;;  %v416_v61 = vld [vmem:[%s1999_s3 + $0x688] sm:$0xff]  ;;  %v417_v62 = vld [vmem:[%s1999_s3 + $0x690] sm:$0xff]  ;;  %v869_v63 = vadd.f32 %v2054_v41, %v415_v60 }
  0xc1   : > { %1247 = vst [vmem:[%s2048_s18 + $0x5d0] sm:$0xff] %v847_v7  ;;  %1248 = vst [vmem:[%s2048_s18 + $0x5d8] sm:$0xff] %v848_v11  ;;  %v870_v0 = vadd.f32 %v2056_v42, %v416_v61  ;;  %v871_v1 = vadd.f32 %v2011_v13, %v417_v62  ;;  %v418_v2 = vld [vmem:[%s1999_s3 + $0x698] sm:$0xff]  ;;  %v419_v3 = vld [vmem:[%s1999_s3 + $0x6a0] sm:$0xff] }
  0xc2   : > { %1249 = vst [vmem:[%s2048_s18 + $0x5e0] sm:$0xff] %v849_v12  ;;  %1250 = vst [vmem:[%s2048_s18 + $0x5e8] sm:$0xff] %v850_v15  ;;  %v420_v4 = vld [vmem:[%s1999_s3 + $0x6a8] sm:$0xff]  ;;  %v872_v5 = vadd.f32 %v2013_v14, %v418_v2  ;;  %v873_v6 = vadd.f32 %v2016_v16, %v419_v3  ;;  %v421_v8 = vld [vmem:[%s1999_s3 + $0x6b0] sm:$0xff] }
  0xc3   : > { %1251 = vst [vmem:[%s2048_s18 + $0x5f0] sm:$0xff] %v851_v23  ;;  %1252 = vst [vmem:[%s2048_s18 + $0x5f8] sm:$0xff] %v852_v25  ;;  %v874_v7 = vadd.f32 %v2019_v18, %v420_v4  ;;  %v422_v9 = vld [vmem:[%s1999_s3 + $0x6b8] sm:$0xff]  ;;  %v423_v10 = vld [vmem:[%s1999_s3 + $0x6c0] sm:$0xff]  ;;  %v875_v11 = vadd.f32 %v2022_v20, %v421_v8 }
  0xc4   : > { %1253 = vst [vmem:[%s2048_s18 + $0x600] sm:$0xff] %v853_v27  ;;  %1254 = vst [vmem:[%s2048_s18 + $0x608] sm:$0xff] %v854_v31  ;;  %v876_v12 = vadd.f32 %v2025_v22, %v422_v9  ;;  %v877_v15 = vadd.f32 %v2028_v24, %v423_v10  ;;  %v424_v17 = vld [vmem:[%s1999_s3 + $0x6c8] sm:$0xff]  ;;  %v425_v19 = vld [vmem:[%s1999_s3 + $0x6d0] sm:$0xff] }
  0xc5   : > { %1255 = vst [vmem:[%s2048_s18 + $0x610] sm:$0xff] %v855_v32  ;;  %1256 = vst [vmem:[%s2048_s18 + $0x618] sm:$0xff] %v856_v33  ;;  %v426_v21 = vld [vmem:[%s1999_s3 + $0x6d8] sm:$0xff]  ;;  %v878_v23 = vadd.f32 %v2031_v26, %v424_v17  ;;  %v879_v25 = vadd.f32 %v2054_v41, %v425_v19  ;;  %v427_v28 = vld [vmem:[%s1999_s3 + $0x6e0] sm:$0xff] }
  0xc6   : > { %1257 = vst [vmem:[%s2048_s18 + $0x620] sm:$0xff] %v857_v37  ;;  %1258 = vst [vmem:[%s2048_s18 + $0x628] sm:$0xff] %v858_v38  ;;  %v880_v27 = vadd.f32 %v2056_v42, %v426_v21  ;;  %v428_v29 = vld [vmem:[%s1999_s3 + $0x6e8] sm:$0xff]  ;;  %v429_v30 = vld [vmem:[%s1999_s3 + $0x6f0] sm:$0xff]  ;;  %v881_v31 = vadd.f32 %v2011_v13, %v427_v28 }
  0xc7   : > { %1259 = vst [vmem:[%s2048_s18 + $0x630] sm:$0xff] %v859_v39  ;;  %1260 = vst [vmem:[%s2048_s18 + $0x638] sm:$0xff] %v860_v45  ;;  %v882_v32 = vadd.f32 %v2013_v14, %v428_v29  ;;  %v883_v33 = vadd.f32 %v2016_v16, %v429_v30  ;;  %v430_v34 = vld [vmem:[%s1999_s3 + $0x6f8] sm:$0xff]  ;;  %v431_v35 = vld [vmem:[%s1999_s3 + $0x700] sm:$0xff] }
  0xc8   : > { %1261 = vst [vmem:[%s2048_s18 + $0x640] sm:$0xff] %v861_v46  ;;  %1262 = vst [vmem:[%s2048_s18 + $0x648] sm:$0xff] %v862_v47  ;;  %v432_v36 = vld [vmem:[%s1999_s3 + $0x708] sm:$0xff]  ;;  %v884_v37 = vadd.f32 %v2019_v18, %v430_v34  ;;  %v885_v38 = vadd.f32 %v2022_v20, %v431_v35  ;;  %v433_v40 = vld [vmem:[%s1999_s3 + $0x710] sm:$0xff] }
  0xc9   : > { %1263 = vst [vmem:[%s2048_s18 + $0x650] sm:$0xff] %v863_v51  ;;  %1264 = vst [vmem:[%s2048_s18 + $0x658] sm:$0xff] %v864_v52  ;;  %v886_v39 = vadd.f32 %v2025_v22, %v432_v36  ;;  %v434_v43 = vld [vmem:[%s1999_s3 + $0x718] sm:$0xff]  ;;  %v435_v44 = vld [vmem:[%s1999_s3 + $0x720] sm:$0xff]  ;;  %v887_v45 = vadd.f32 %v2028_v24, %v433_v40 }
  0xca   : > { %1265 = vst [vmem:[%s2048_s18 + $0x660] sm:$0xff] %v865_v53  ;;  %1266 = vst [vmem:[%s2048_s18 + $0x668] sm:$0xff] %v866_v57  ;;  %v888_v46 = vadd.f32 %v2031_v26, %v434_v43  ;;  %v889_v47 = vadd.f32 %v2054_v41, %v435_v44  ;;  %v436_v48 = vld [vmem:[%s1999_s3 + $0x728] sm:$0xff]  ;;  %v437_v49 = vld [vmem:[%s1999_s3 + $0x730] sm:$0xff] }
  0xcb   : > { %1267 = vst [vmem:[%s2048_s18 + $0x670] sm:$0xff] %v867_v58  ;;  %1268 = vst [vmem:[%s2048_s18 + $0x678] sm:$0xff] %v868_v59  ;;  %v438_v50 = vld [vmem:[%s1999_s3 + $0x738] sm:$0xff]  ;;  %v890_v51 = vadd.f32 %v2056_v42, %v436_v48  ;;  %v891_v52 = vadd.f32 %v2011_v13, %v437_v49  ;;  %v439_v54 = vld [vmem:[%s1999_s3 + $0x740] sm:$0xff] }
  0xcc   : > { %1269 = vst [vmem:[%s2048_s18 + $0x680] sm:$0xff] %v869_v63  ;;  %1270 = vst [vmem:[%s2048_s18 + $0x688] sm:$0xff] %v870_v0  ;;  %v892_v53 = vadd.f32 %v2013_v14, %v438_v50  ;;  %v440_v55 = vld [vmem:[%s1999_s3 + $0x748] sm:$0xff]  ;;  %v441_v56 = vld [vmem:[%s1999_s3 + $0x750] sm:$0xff]  ;;  %v893_v57 = vadd.f32 %v2016_v16, %v439_v54 }
  0xcd   : > { %1271 = vst [vmem:[%s2048_s18 + $0x690] sm:$0xff] %v871_v1  ;;  %1272 = vst [vmem:[%s2048_s18 + $0x698] sm:$0xff] %v872_v5  ;;  %v894_v58 = vadd.f32 %v2019_v18, %v440_v55  ;;  %v895_v59 = vadd.f32 %v2022_v20, %v441_v56  ;;  %v442_v60 = vld [vmem:[%s1999_s3 + $0x758] sm:$0xff]  ;;  %v443_v61 = vld [vmem:[%s1999_s3 + $0x760] sm:$0xff] }
  0xce   : > { %1273 = vst [vmem:[%s2048_s18 + $0x6a0] sm:$0xff] %v873_v6  ;;  %1274 = vst [vmem:[%s2048_s18 + $0x6a8] sm:$0xff] %v874_v7  ;;  %v444_v62 = vld [vmem:[%s1999_s3 + $0x768] sm:$0xff]  ;;  %v896_v63 = vadd.f32 %v2025_v22, %v442_v60  ;;  %v897_v0 = vadd.f32 %v2028_v24, %v443_v61  ;;  %v445_v2 = vld [vmem:[%s1999_s3 + $0x770] sm:$0xff] }
  0xcf   : > { %1275 = vst [vmem:[%s2048_s18 + $0x6b0] sm:$0xff] %v875_v11  ;;  %1276 = vst [vmem:[%s2048_s18 + $0x6b8] sm:$0xff] %v876_v12  ;;  %v898_v1 = vadd.f32 %v2031_v26, %v444_v62  ;;  %v446_v3 = vld [vmem:[%s1999_s3 + $0x778] sm:$0xff]  ;;  %v447_v4 = vld [vmem:[%s1999_s3 + $0x780] sm:$0xff]  ;;  %v899_v5 = vadd.f32 %v2054_v41, %v445_v2 }
  0xd0   : > { %1277 = vst [vmem:[%s2048_s18 + $0x6c0] sm:$0xff] %v877_v15  ;;  %1278 = vst [vmem:[%s2048_s18 + $0x6c8] sm:$0xff] %v878_v23  ;;  %v900_v6 = vadd.f32 %v2056_v42, %v446_v3  ;;  %v901_v7 = vadd.f32 %v2011_v13, %v447_v4  ;;  %v448_v8 = vld [vmem:[%s1999_s3 + $0x788] sm:$0xff]  ;;  %v449_v9 = vld [vmem:[%s1999_s3 + $0x790] sm:$0xff] }
  0xd1   : > { %1279 = vst [vmem:[%s2048_s18 + $0x6d0] sm:$0xff] %v879_v25  ;;  %1280 = vst [vmem:[%s2048_s18 + $0x6d8] sm:$0xff] %v880_v27  ;;  %v450_v10 = vld [vmem:[%s1999_s3 + $0x798] sm:$0xff]  ;;  %v902_v11 = vadd.f32 %v2013_v14, %v448_v8  ;;  %v903_v12 = vadd.f32 %v2016_v16, %v449_v9  ;;  %v451_v17 = vld [vmem:[%s1999_s3 + $0x7a0] sm:$0xff] }
  0xd2   : > { %1281 = vst [vmem:[%s2048_s18 + $0x6e0] sm:$0xff] %v881_v31  ;;  %1282 = vst [vmem:[%s2048_s18 + $0x6e8] sm:$0xff] %v882_v32  ;;  %v904_v15 = vadd.f32 %v2019_v18, %v450_v10  ;;  %v452_v19 = vld [vmem:[%s1999_s3 + $0x7a8] sm:$0xff]  ;;  %v453_v21 = vld [vmem:[%s1999_s3 + $0x7b0] sm:$0xff]  ;;  %v905_v23 = vadd.f32 %v2022_v20, %v451_v17 }
  0xd3   : > { %1283 = vst [vmem:[%s2048_s18 + $0x6f0] sm:$0xff] %v883_v33  ;;  %1284 = vst [vmem:[%s2048_s18 + $0x6f8] sm:$0xff] %v884_v37  ;;  %v906_v25 = vadd.f32 %v2025_v22, %v452_v19  ;;  %v907_v27 = vadd.f32 %v2028_v24, %v453_v21  ;;  %v454_v28 = vld [vmem:[%s1999_s3 + $0x7b8] sm:$0xff]  ;;  %v455_v29 = vld [vmem:[%s1999_s3 + $0x7c0] sm:$0xff] }
  0xd4   : > { %1285 = vst [vmem:[%s2048_s18 + $0x700] sm:$0xff] %v885_v38  ;;  %1286 = vst [vmem:[%s2048_s18 + $0x708] sm:$0xff] %v886_v39  ;;  %v456_v30 = vld [vmem:[%s1999_s3 + $0x7c8] sm:$0xff]  ;;  %v908_v31 = vadd.f32 %v2031_v26, %v454_v28  ;;  %v909_v32 = vadd.f32 %v2054_v41, %v455_v29  ;;  %v457_v34 = vld [vmem:[%s1999_s3 + $0x7d0] sm:$0xff] }
  0xd5   : > { %1287 = vst [vmem:[%s2048_s18 + $0x710] sm:$0xff] %v887_v45  ;;  %1288 = vst [vmem:[%s2048_s18 + $0x718] sm:$0xff] %v888_v46  ;;  %v910_v33 = vadd.f32 %v2056_v42, %v456_v30  ;;  %v458_v35 = vld [vmem:[%s1999_s3 + $0x7d8] sm:$0xff]  ;;  %v459_v36 = vld [vmem:[%s1999_s3 + $0x7e0] sm:$0xff]  ;;  %v911_v37 = vadd.f32 %v2011_v13, %v457_v34 }
  0xd6   : > { %1289 = vst [vmem:[%s2048_s18 + $0x720] sm:$0xff] %v889_v47  ;;  %1290 = vst [vmem:[%s2048_s18 + $0x728] sm:$0xff] %v890_v51  ;;  %v912_v38 = vadd.f32 %v2013_v14, %v458_v35  ;;  %v913_v39 = vadd.f32 %v2016_v16, %v459_v36  ;;  %v460_v40 = vld [vmem:[%s1999_s3 + $0x7e8] sm:$0xff]  ;;  %v461_v43 = vld [vmem:[%s1999_s3 + $0x7f0] sm:$0xff] }
  0xd7   : > { %1291 = vst [vmem:[%s2048_s18 + $0x730] sm:$0xff] %v891_v52  ;;  %1292 = vst [vmem:[%s2048_s18 + $0x738] sm:$0xff] %v892_v53  ;;  %v462_v44 = vld [vmem:[%s1999_s3 + $0x7f8] sm:$0xff]  ;;  %v914_v45 = vadd.f32 %v2019_v18, %v460_v40  ;;  %v915_v46 = vadd.f32 %v2022_v20, %v461_v43  ;;  %v463_v48 = vld [vmem:[%s1999_s3 + $0x800] sm:$0xff] }
  0xd8   : > { %1293 = vst [vmem:[%s2048_s18 + $0x740] sm:$0xff] %v893_v57  ;;  %1294 = vst [vmem:[%s2048_s18 + $0x748] sm:$0xff] %v894_v58  ;;  %v916_v47 = vadd.f32 %v2025_v22, %v462_v44  ;;  %v464_v49 = vld [vmem:[%s1999_s3 + $0x808] sm:$0xff]  ;;  %v465_v50 = vld [vmem:[%s1999_s3 + $0x810] sm:$0xff]  ;;  %v917_v51 = vadd.f32 %v2028_v24, %v463_v48 }
  0xd9   : > { %1295 = vst [vmem:[%s2048_s18 + $0x750] sm:$0xff] %v895_v59  ;;  %1296 = vst [vmem:[%s2048_s18 + $0x758] sm:$0xff] %v896_v63  ;;  %v918_v52 = vadd.f32 %v2031_v26, %v464_v49  ;;  %v919_v53 = vadd.f32 %v2054_v41, %v465_v50  ;;  %v466_v54 = vld [vmem:[%s1999_s3 + $0x818] sm:$0xff]  ;;  %v467_v55 = vld [vmem:[%s1999_s3 + $0x820] sm:$0xff] }
  0xda   : > { %1297 = vst [vmem:[%s2048_s18 + $0x760] sm:$0xff] %v897_v0  ;;  %1298 = vst [vmem:[%s2048_s18 + $0x768] sm:$0xff] %v898_v1  ;;  %v468_v56 = vld [vmem:[%s1999_s3 + $0x828] sm:$0xff]  ;;  %v920_v57 = vadd.f32 %v2056_v42, %v466_v54  ;;  %v921_v58 = vadd.f32 %v2011_v13, %v467_v55  ;;  %v469_v60 = vld [vmem:[%s1999_s3 + $0x830] sm:$0xff] }
  0xdb   : > { %1299 = vst [vmem:[%s2048_s18 + $0x770] sm:$0xff] %v899_v5  ;;  %1300 = vst [vmem:[%s2048_s18 + $0x778] sm:$0xff] %v900_v6  ;;  %v922_v59 = vadd.f32 %v2013_v14, %v468_v56  ;;  %v470_v61 = vld [vmem:[%s1999_s3 + $0x838] sm:$0xff]  ;;  %v471_v62 = vld [vmem:[%s1999_s3 + $0x840] sm:$0xff]  ;;  %v923_v63 = vadd.f32 %v2016_v16, %v469_v60 }
  0xdc   : > { %1301 = vst [vmem:[%s2048_s18 + $0x780] sm:$0xff] %v901_v7  ;;  %1302 = vst [vmem:[%s2048_s18 + $0x788] sm:$0xff] %v902_v11  ;;  %v924_v0 = vadd.f32 %v2019_v18, %v470_v61  ;;  %v925_v1 = vadd.f32 %v2022_v20, %v471_v62  ;;  %v472_v2 = vld [vmem:[%s1999_s3 + $0x848] sm:$0xff]  ;;  %v473_v3 = vld [vmem:[%s1999_s3 + $0x850] sm:$0xff] }
  0xdd   : > { %1303 = vst [vmem:[%s2048_s18 + $0x790] sm:$0xff] %v903_v12  ;;  %1304 = vst [vmem:[%s2048_s18 + $0x798] sm:$0xff] %v904_v15  ;;  %v474_v4 = vld [vmem:[%s1999_s3 + $0x858] sm:$0xff]  ;;  %v926_v5 = vadd.f32 %v2025_v22, %v472_v2  ;;  %v927_v6 = vadd.f32 %v2028_v24, %v473_v3  ;;  %v475_v8 = vld [vmem:[%s1999_s3 + $0x860] sm:$0xff] }
  0xde   : > { %1305 = vst [vmem:[%s2048_s18 + $0x7a0] sm:$0xff] %v905_v23  ;;  %1306 = vst [vmem:[%s2048_s18 + $0x7a8] sm:$0xff] %v906_v25  ;;  %v928_v7 = vadd.f32 %v2031_v26, %v474_v4  ;;  %v476_v9 = vld [vmem:[%s1999_s3 + $0x868] sm:$0xff]  ;;  %v477_v10 = vld [vmem:[%s1999_s3 + $0x870] sm:$0xff]  ;;  %v929_v11 = vadd.f32 %v2054_v41, %v475_v8 }
  0xdf   : > { %1307 = vst [vmem:[%s2048_s18 + $0x7b0] sm:$0xff] %v907_v27  ;;  %1308 = vst [vmem:[%s2048_s18 + $0x7b8] sm:$0xff] %v908_v31  ;;  %v930_v12 = vadd.f32 %v2056_v42, %v476_v9  ;;  %v931_v15 = vadd.f32 %v2011_v13, %v477_v10  ;;  %v478_v17 = vld [vmem:[%s1999_s3 + $0x878] sm:$0xff]  ;;  %v479_v19 = vld [vmem:[%s1999_s3 + $0x880] sm:$0xff] }
  0xe0   : > { %1309 = vst [vmem:[%s2048_s18 + $0x7c0] sm:$0xff] %v909_v32  ;;  %1310 = vst [vmem:[%s2048_s18 + $0x7c8] sm:$0xff] %v910_v33  ;;  %v480_v21 = vld [vmem:[%s1999_s3 + $0x888] sm:$0xff]  ;;  %v932_v23 = vadd.f32 %v2013_v14, %v478_v17  ;;  %v933_v25 = vadd.f32 %v2016_v16, %v479_v19  ;;  %v481_v28 = vld [vmem:[%s1999_s3 + $0x890] sm:$0xff] }
  0xe1   : > { %1311 = vst [vmem:[%s2048_s18 + $0x7d0] sm:$0xff] %v911_v37  ;;  %1312 = vst [vmem:[%s2048_s18 + $0x7d8] sm:$0xff] %v912_v38  ;;  %v934_v27 = vadd.f32 %v2019_v18, %v480_v21  ;;  %v482_v29 = vld [vmem:[%s1999_s3 + $0x898] sm:$0xff]  ;;  %v483_v30 = vld [vmem:[%s1999_s3 + $0x8a0] sm:$0xff]  ;;  %v935_v31 = vadd.f32 %v2022_v20, %v481_v28 }
  0xe2   : > { %1313 = vst [vmem:[%s2048_s18 + $0x7e0] sm:$0xff] %v913_v39  ;;  %1314 = vst [vmem:[%s2048_s18 + $0x7e8] sm:$0xff] %v914_v45  ;;  %v936_v32 = vadd.f32 %v2025_v22, %v482_v29  ;;  %v937_v33 = vadd.f32 %v2028_v24, %v483_v30  ;;  %v484_v34 = vld [vmem:[%s1999_s3 + $0x8a8] sm:$0xff]  ;;  %v485_v35 = vld [vmem:[%s1999_s3 + $0x8b0] sm:$0xff] }
  0xe3   : > { %1315 = vst [vmem:[%s2048_s18 + $0x7f0] sm:$0xff] %v915_v46  ;;  %1316 = vst [vmem:[%s2048_s18 + $0x7f8] sm:$0xff] %v916_v47  ;;  %v486_v36 = vld [vmem:[%s1999_s3 + $0x8b8] sm:$0xff]  ;;  %v938_v37 = vadd.f32 %v2031_v26, %v484_v34  ;;  %v939_v38 = vadd.f32 %v2054_v41, %v485_v35  ;;  %v487_v40 = vld [vmem:[%s1999_s3 + $0x8c0] sm:$0xff] }
  0xe4   : > { %1317 = vst [vmem:[%s2048_s18 + $0x800] sm:$0xff] %v917_v51  ;;  %1318 = vst [vmem:[%s2048_s18 + $0x808] sm:$0xff] %v918_v52  ;;  %v940_v39 = vadd.f32 %v2056_v42, %v486_v36  ;;  %v488_v43 = vld [vmem:[%s1999_s3 + $0x8c8] sm:$0xff]  ;;  %v489_v44 = vld [vmem:[%s1999_s3 + $0x8d0] sm:$0xff]  ;;  %v941_v45 = vadd.f32 %v2011_v13, %v487_v40 }
  0xe5   : > { %1319 = vst [vmem:[%s2048_s18 + $0x810] sm:$0xff] %v919_v53  ;;  %1320 = vst [vmem:[%s2048_s18 + $0x818] sm:$0xff] %v920_v57  ;;  %v942_v46 = vadd.f32 %v2013_v14, %v488_v43  ;;  %v943_v47 = vadd.f32 %v2016_v16, %v489_v44  ;;  %v490_v48 = vld [vmem:[%s1999_s3 + $0x8d8] sm:$0xff]  ;;  %v491_v49 = vld [vmem:[%s1999_s3 + $0x8e0] sm:$0xff] }
  0xe6   : > { %1321 = vst [vmem:[%s2048_s18 + $0x820] sm:$0xff] %v921_v58  ;;  %1322 = vst [vmem:[%s2048_s18 + $0x828] sm:$0xff] %v922_v59  ;;  %v492_v50 = vld [vmem:[%s1999_s3 + $0x8e8] sm:$0xff]  ;;  %v944_v51 = vadd.f32 %v2019_v18, %v490_v48  ;;  %v945_v52 = vadd.f32 %v2022_v20, %v491_v49  ;;  %v493_v54 = vld [vmem:[%s1999_s3 + $0x8f0] sm:$0xff] }
  0xe7   : > { %1323 = vst [vmem:[%s2048_s18 + $0x830] sm:$0xff] %v923_v63  ;;  %1324 = vst [vmem:[%s2048_s18 + $0x838] sm:$0xff] %v924_v0  ;;  %v946_v53 = vadd.f32 %v2025_v22, %v492_v50  ;;  %v494_v55 = vld [vmem:[%s1999_s3 + $0x8f8] sm:$0xff]  ;;  %v495_v56 = vld [vmem:[%s1999_s3 + $0x900] sm:$0xff]  ;;  %v947_v57 = vadd.f32 %v2028_v24, %v493_v54 }
  0xe8   : > { %1325 = vst [vmem:[%s2048_s18 + $0x840] sm:$0xff] %v925_v1  ;;  %1326 = vst [vmem:[%s2048_s18 + $0x848] sm:$0xff] %v926_v5  ;;  %v948_v58 = vadd.f32 %v2031_v26, %v494_v55  ;;  %v949_v59 = vadd.f32 %v2054_v41, %v495_v56  ;;  %v496_v60 = vld [vmem:[%s1999_s3 + $0x908] sm:$0xff]  ;;  %v497_v61 = vld [vmem:[%s1999_s3 + $0x910] sm:$0xff] }
  0xe9   : > { %1327 = vst [vmem:[%s2048_s18 + $0x850] sm:$0xff] %v927_v6  ;;  %1328 = vst [vmem:[%s2048_s18 + $0x858] sm:$0xff] %v928_v7  ;;  %v498_v62 = vld [vmem:[%s1999_s3 + $0x918] sm:$0xff]  ;;  %v950_v63 = vadd.f32 %v2056_v42, %v496_v60  ;;  %v951_v0 = vadd.f32 %v2011_v13, %v497_v61  ;;  %v499_v2 = vld [vmem:[%s1999_s3 + $0x920] sm:$0xff] }
  0xea   : > { %1329 = vst [vmem:[%s2048_s18 + $0x860] sm:$0xff] %v929_v11  ;;  %1330 = vst [vmem:[%s2048_s18 + $0x868] sm:$0xff] %v930_v12  ;;  %v952_v1 = vadd.f32 %v2013_v14, %v498_v62  ;;  %v500_v3 = vld [vmem:[%s1999_s3 + $0x928] sm:$0xff]  ;;  %v501_v4 = vld [vmem:[%s1999_s3 + $0x930] sm:$0xff]  ;;  %v953_v5 = vadd.f32 %v2016_v16, %v499_v2 }
  0xeb   : > { %1331 = vst [vmem:[%s2048_s18 + $0x870] sm:$0xff] %v931_v15  ;;  %1332 = vst [vmem:[%s2048_s18 + $0x878] sm:$0xff] %v932_v23  ;;  %v954_v6 = vadd.f32 %v2019_v18, %v500_v3  ;;  %v955_v7 = vadd.f32 %v2022_v20, %v501_v4  ;;  %v502_v8 = vld [vmem:[%s1999_s3 + $0x938] sm:$0xff]  ;;  %v503_v9 = vld [vmem:[%s1999_s3 + $0x940] sm:$0xff] }
  0xec   : > { %1333 = vst [vmem:[%s2048_s18 + $0x880] sm:$0xff] %v933_v25  ;;  %1334 = vst [vmem:[%s2048_s18 + $0x888] sm:$0xff] %v934_v27  ;;  %v504_v10 = vld [vmem:[%s1999_s3 + $0x948] sm:$0xff]  ;;  %v956_v11 = vadd.f32 %v2025_v22, %v502_v8  ;;  %v957_v12 = vadd.f32 %v2028_v24, %v503_v9  ;;  %v505_v17 = vld [vmem:[%s1999_s3 + $0x950] sm:$0xff] }
  0xed   : > { %1335 = vst [vmem:[%s2048_s18 + $0x890] sm:$0xff] %v935_v31  ;;  %1336 = vst [vmem:[%s2048_s18 + $0x898] sm:$0xff] %v936_v32  ;;  %v958_v15 = vadd.f32 %v2031_v26, %v504_v10  ;;  %v506_v19 = vld [vmem:[%s1999_s3 + $0x958] sm:$0xff]  ;;  %v507_v21 = vld [vmem:[%s1999_s3 + $0x960] sm:$0xff]  ;;  %v959_v23 = vadd.f32 %v2054_v41, %v505_v17 }
  0xee   : > { %1337 = vst [vmem:[%s2048_s18 + $0x8a0] sm:$0xff] %v937_v33  ;;  %1338 = vst [vmem:[%s2048_s18 + $0x8a8] sm:$0xff] %v938_v37  ;;  %v960_v25 = vadd.f32 %v2056_v42, %v506_v19  ;;  %v961_v27 = vadd.f32 %v2011_v13, %v507_v21  ;;  %v508_v28 = vld [vmem:[%s1999_s3 + $0x968] sm:$0xff]  ;;  %v509_v29 = vld [vmem:[%s1999_s3 + $0x970] sm:$0xff] }
  0xef   : > { %1339 = vst [vmem:[%s2048_s18 + $0x8b0] sm:$0xff] %v939_v38  ;;  %1340 = vst [vmem:[%s2048_s18 + $0x8b8] sm:$0xff] %v940_v39  ;;  %v510_v30 = vld [vmem:[%s1999_s3 + $0x978] sm:$0xff]  ;;  %v962_v31 = vadd.f32 %v2013_v14, %v508_v28  ;;  %v963_v32 = vadd.f32 %v2016_v16, %v509_v29  ;;  %v511_v34 = vld [vmem:[%s1999_s3 + $0x980] sm:$0xff] }
  0xf0   : > { %1341 = vst [vmem:[%s2048_s18 + $0x8c0] sm:$0xff] %v941_v45  ;;  %1342 = vst [vmem:[%s2048_s18 + $0x8c8] sm:$0xff] %v942_v46  ;;  %v964_v33 = vadd.f32 %v2019_v18, %v510_v30  ;;  %v512_v35 = vld [vmem:[%s1999_s3 + $0x988] sm:$0xff]  ;;  %v513_v36 = vld [vmem:[%s1999_s3 + $0x990] sm:$0xff]  ;;  %v965_v37 = vadd.f32 %v2022_v20, %v511_v34 }
  0xf1   : > { %1343 = vst [vmem:[%s2048_s18 + $0x8d0] sm:$0xff] %v943_v47  ;;  %1344 = vst [vmem:[%s2048_s18 + $0x8d8] sm:$0xff] %v944_v51  ;;  %v966_v38 = vadd.f32 %v2025_v22, %v512_v35  ;;  %v967_v39 = vadd.f32 %v2028_v24, %v513_v36  ;;  %v514_v40 = vld [vmem:[%s1999_s3 + $0x998] sm:$0xff]  ;;  %v515_v43 = vld [vmem:[%s1999_s3 + $0x9a0] sm:$0xff] }
  0xf2   : > { %1345 = vst [vmem:[%s2048_s18 + $0x8e0] sm:$0xff] %v945_v52  ;;  %1346 = vst [vmem:[%s2048_s18 + $0x8e8] sm:$0xff] %v946_v53  ;;  %v516_v44 = vld [vmem:[%s1999_s3 + $0x9a8] sm:$0xff]  ;;  %v968_v45 = vadd.f32 %v2031_v26, %v514_v40  ;;  %v969_v46 = vadd.f32 %v2054_v41, %v515_v43  ;;  %v517_v48 = vld [vmem:[%s1999_s3 + $0x9b0] sm:$0xff] }
  0xf3   : > { %1347 = vst [vmem:[%s2048_s18 + $0x8f0] sm:$0xff] %v947_v57  ;;  %1348 = vst [vmem:[%s2048_s18 + $0x8f8] sm:$0xff] %v948_v58  ;;  %v970_v47 = vadd.f32 %v2056_v42, %v516_v44  ;;  %v518_v49 = vld [vmem:[%s1999_s3 + $0x9b8] sm:$0xff]  ;;  %v519_v50 = vld [vmem:[%s1999_s3 + $0x9c0] sm:$0xff]  ;;  %v971_v51 = vadd.f32 %v2011_v13, %v517_v48 }
  0xf4   : > { %1349 = vst [vmem:[%s2048_s18 + $0x900] sm:$0xff] %v949_v59  ;;  %1350 = vst [vmem:[%s2048_s18 + $0x908] sm:$0xff] %v950_v63  ;;  %v972_v52 = vadd.f32 %v2013_v14, %v518_v49  ;;  %v973_v53 = vadd.f32 %v2016_v16, %v519_v50  ;;  %v520_v54 = vld [vmem:[%s1999_s3 + $0x9c8] sm:$0xff]  ;;  %v521_v55 = vld [vmem:[%s1999_s3 + $0x9d0] sm:$0xff] }
  0xf5   : > { %1351 = vst [vmem:[%s2048_s18 + $0x910] sm:$0xff] %v951_v0  ;;  %1352 = vst [vmem:[%s2048_s18 + $0x918] sm:$0xff] %v952_v1  ;;  %v522_v56 = vld [vmem:[%s1999_s3 + $0x9d8] sm:$0xff]  ;;  %v974_v57 = vadd.f32 %v2019_v18, %v520_v54  ;;  %v975_v58 = vadd.f32 %v2022_v20, %v521_v55  ;;  %v523_v60 = vld [vmem:[%s1999_s3 + $0x9e0] sm:$0xff] }
  0xf6   : > { %1353 = vst [vmem:[%s2048_s18 + $0x920] sm:$0xff] %v953_v5  ;;  %1354 = vst [vmem:[%s2048_s18 + $0x928] sm:$0xff] %v954_v6  ;;  %v976_v59 = vadd.f32 %v2025_v22, %v522_v56  ;;  %v524_v61 = vld [vmem:[%s1999_s3 + $0x9e8] sm:$0xff]  ;;  %v525_v62 = vld [vmem:[%s1999_s3 + $0x9f0] sm:$0xff]  ;;  %v977_v63 = vadd.f32 %v2028_v24, %v523_v60 }
  0xf7   : > { %1355 = vst [vmem:[%s2048_s18 + $0x930] sm:$0xff] %v955_v7  ;;  %1356 = vst [vmem:[%s2048_s18 + $0x938] sm:$0xff] %v956_v11  ;;  %v978_v0 = vadd.f32 %v2031_v26, %v524_v61  ;;  %v979_v1 = vadd.f32 %v2054_v41, %v525_v62  ;;  %v526_v2 = vld [vmem:[%s1999_s3 + $0x9f8] sm:$0xff]  ;;  %v527_v3 = vld [vmem:[%s1999_s3 + $0xa00] sm:$0xff] }
  0xf8   : > { %1357 = vst [vmem:[%s2048_s18 + $0x940] sm:$0xff] %v957_v12  ;;  %1358 = vst [vmem:[%s2048_s18 + $0x948] sm:$0xff] %v958_v15  ;;  %v528_v4 = vld [vmem:[%s1999_s3 + $0xa08] sm:$0xff]  ;;  %v980_v5 = vadd.f32 %v2056_v42, %v526_v2  ;;  %v981_v6 = vadd.f32 %v2011_v13, %v527_v3  ;;  %v529_v8 = vld [vmem:[%s1999_s3 + $0xa10] sm:$0xff] }
  0xf9   : > { %1359 = vst [vmem:[%s2048_s18 + $0x950] sm:$0xff] %v959_v23  ;;  %1360 = vst [vmem:[%s2048_s18 + $0x958] sm:$0xff] %v960_v25  ;;  %v982_v7 = vadd.f32 %v2013_v14, %v528_v4  ;;  %v530_v9 = vld [vmem:[%s1999_s3 + $0xa18] sm:$0xff]  ;;  %v531_v10 = vld [vmem:[%s1999_s3 + $0xa20] sm:$0xff]  ;;  %v983_v11 = vadd.f32 %v2016_v16, %v529_v8 }
  0xfa   : > { %1361 = vst [vmem:[%s2048_s18 + $0x960] sm:$0xff] %v961_v27  ;;  %1362 = vst [vmem:[%s2048_s18 + $0x968] sm:$0xff] %v962_v31  ;;  %v984_v12 = vadd.f32 %v2019_v18, %v530_v9  ;;  %v985_v15 = vadd.f32 %v2022_v20, %v531_v10  ;;  %v532_v17 = vld [vmem:[%s1999_s3 + $0xa28] sm:$0xff]  ;;  %v533_v19 = vld [vmem:[%s1999_s3 + $0xa30] sm:$0xff] }
  0xfb   : > { %1363 = vst [vmem:[%s2048_s18 + $0x970] sm:$0xff] %v963_v32  ;;  %1364 = vst [vmem:[%s2048_s18 + $0x978] sm:$0xff] %v964_v33  ;;  %v534_v21 = vld [vmem:[%s1999_s3 + $0xa38] sm:$0xff]  ;;  %v986_v23 = vadd.f32 %v2025_v22, %v532_v17  ;;  %v987_v25 = vadd.f32 %v2028_v24, %v533_v19  ;;  %v535_v28 = vld [vmem:[%s1999_s3 + $0xa40] sm:$0xff] }
  0xfc   : > { %1365 = vst [vmem:[%s2048_s18 + $0x980] sm:$0xff] %v965_v37  ;;  %1366 = vst [vmem:[%s2048_s18 + $0x988] sm:$0xff] %v966_v38  ;;  %v988_v27 = vadd.f32 %v2031_v26, %v534_v21  ;;  %v536_v29 = vld [vmem:[%s1999_s3 + $0xa48] sm:$0xff]  ;;  %v537_v30 = vld [vmem:[%s1999_s3 + $0xa50] sm:$0xff]  ;;  %v989_v31 = vadd.f32 %v2054_v41, %v535_v28 }
  0xfd   : > { %1367 = vst [vmem:[%s2048_s18 + $0x990] sm:$0xff] %v967_v39  ;;  %1368 = vst [vmem:[%s2048_s18 + $0x998] sm:$0xff] %v968_v45  ;;  %v990_v32 = vadd.f32 %v2056_v42, %v536_v29  ;;  %v991_v33 = vadd.f32 %v2011_v13, %v537_v30  ;;  %v538_v34 = vld [vmem:[%s1999_s3 + $0xa58] sm:$0xff]  ;;  %v539_v35 = vld [vmem:[%s1999_s3 + $0xa60] sm:$0xff] }
  0xfe   : > { %1369 = vst [vmem:[%s2048_s18 + $0x9a0] sm:$0xff] %v969_v46  ;;  %1370 = vst [vmem:[%s2048_s18 + $0x9a8] sm:$0xff] %v970_v47  ;;  %v540_v36 = vld [vmem:[%s1999_s3 + $0xa68] sm:$0xff]  ;;  %v992_v37 = vadd.f32 %v2013_v14, %v538_v34  ;;  %v993_v38 = vadd.f32 %v2016_v16, %v539_v35  ;;  %v541_v40 = vld [vmem:[%s1999_s3 + $0xa70] sm:$0xff] }
  0xff   : > { %1371 = vst [vmem:[%s2048_s18 + $0x9b0] sm:$0xff] %v971_v51  ;;  %1372 = vst [vmem:[%s2048_s18 + $0x9b8] sm:$0xff] %v972_v52  ;;  %v994_v39 = vadd.f32 %v2019_v18, %v540_v36  ;;  %v542_v43 = vld [vmem:[%s1999_s3 + $0xa78] sm:$0xff]  ;;  %v543_v44 = vld [vmem:[%s1999_s3 + $0xa80] sm:$0xff]  ;;  %v995_v45 = vadd.f32 %v2022_v20, %v541_v40 }
 0x100   : > { %1373 = vst [vmem:[%s2048_s18 + $0x9c0] sm:$0xff] %v973_v53  ;;  %1374 = vst [vmem:[%s2048_s18 + $0x9c8] sm:$0xff] %v974_v57  ;;  %v996_v46 = vadd.f32 %v2025_v22, %v542_v43  ;;  %v997_v47 = vadd.f32 %v2028_v24, %v543_v44  ;;  %v544_v48 = vld [vmem:[%s1999_s3 + $0xa88] sm:$0xff]  ;;  %v545_v49 = vld [vmem:[%s1999_s3 + $0xa90] sm:$0xff] }
 0x101   : > { %1375 = vst [vmem:[%s2048_s18 + $0x9d0] sm:$0xff] %v975_v58  ;;  %1376 = vst [vmem:[%s2048_s18 + $0x9d8] sm:$0xff] %v976_v59  ;;  %v546_v50 = vld [vmem:[%s1999_s3 + $0xa98] sm:$0xff]  ;;  %v998_v51 = vadd.f32 %v2031_v26, %v544_v48  ;;  %v999_v52 = vadd.f32 %v2054_v41, %v545_v49  ;;  %v547_v54 = vld [vmem:[%s1999_s3 + $0xaa0] sm:$0xff] }
 0x102   : > { %1377 = vst [vmem:[%s2048_s18 + $0x9e0] sm:$0xff] %v977_v63  ;;  %1378 = vst [vmem:[%s2048_s18 + $0x9e8] sm:$0xff] %v978_v0  ;;  %v1000_v53 = vadd.f32 %v2056_v42, %v546_v50  ;;  %v548_v55 = vld [vmem:[%s1999_s3 + $0xaa8] sm:$0xff]  ;;  %v549_v56 = vld [vmem:[%s1999_s3 + $0xab0] sm:$0xff]  ;;  %v1001_v57 = vadd.f32 %v2011_v13, %v547_v54 }
 0x103   : > { %1379 = vst [vmem:[%s2048_s18 + $0x9f0] sm:$0xff] %v979_v1  ;;  %1380 = vst [vmem:[%s2048_s18 + $0x9f8] sm:$0xff] %v980_v5  ;;  %v1002_v58 = vadd.f32 %v2013_v14, %v548_v55  ;;  %v1003_v59 = vadd.f32 %v2016_v16, %v549_v56  ;;  %v550_v60 = vld [vmem:[%s1999_s3 + $0xab8] sm:$0xff]  ;;  %v551_v61 = vld [vmem:[%s1999_s3 + $0xac0] sm:$0xff] }
 0x104   : > { %1381 = vst [vmem:[%s2048_s18 + $0xa00] sm:$0xff] %v981_v6  ;;  %1382 = vst [vmem:[%s2048_s18 + $0xa08] sm:$0xff] %v982_v7  ;;  %v552_v62 = vld [vmem:[%s1999_s3 + $0xac8] sm:$0xff]  ;;  %v1004_v63 = vadd.f32 %v2019_v18, %v550_v60  ;;  %v1005_v0 = vadd.f32 %v2022_v20, %v551_v61  ;;  %v553_v2 = vld [vmem:[%s1999_s3 + $0xad0] sm:$0xff] }
 0x105   : > { %1383 = vst [vmem:[%s2048_s18 + $0xa10] sm:$0xff] %v983_v11  ;;  %1384 = vst [vmem:[%s2048_s18 + $0xa18] sm:$0xff] %v984_v12  ;;  %v1006_v1 = vadd.f32 %v2025_v22, %v552_v62  ;;  %v554_v3 = vld [vmem:[%s1999_s3 + $0xad8] sm:$0xff]  ;;  %v555_v4 = vld [vmem:[%s1999_s3 + $0xae0] sm:$0xff]  ;;  %v1007_v5 = vadd.f32 %v2028_v24, %v553_v2 }
 0x106   : > { %1385 = vst [vmem:[%s2048_s18 + $0xa20] sm:$0xff] %v985_v15  ;;  %1386 = vst [vmem:[%s2048_s18 + $0xa28] sm:$0xff] %v986_v23  ;;  %v1008_v6 = vadd.f32 %v2031_v26, %v554_v3  ;;  %v1009_v7 = vadd.f32 %v2054_v41, %v555_v4  ;;  %v556_v8 = vld [vmem:[%s1999_s3 + $0xae8] sm:$0xff]  ;;  %v557_v9 = vld [vmem:[%s1999_s3 + $0xaf0] sm:$0xff] }
 0x107   : > { %1387 = vst [vmem:[%s2048_s18 + $0xa30] sm:$0xff] %v987_v25  ;;  %1388 = vst [vmem:[%s2048_s18 + $0xa38] sm:$0xff] %v988_v27  ;;  %v558_v10 = vld [vmem:[%s1999_s3 + $0xaf8] sm:$0xff]  ;;  %v1010_v11 = vadd.f32 %v2056_v42, %v556_v8  ;;  %v1011_v12 = vadd.f32 %v2011_v13, %v557_v9  ;;  %v559_v17 = vld [vmem:[%s1999_s3 + $0xb00] sm:$0xff] }
 0x108   : > { %1389 = vst [vmem:[%s2048_s18 + $0xa40] sm:$0xff] %v989_v31  ;;  %1390 = vst [vmem:[%s2048_s18 + $0xa48] sm:$0xff] %v990_v32  ;;  %v1012_v15 = vadd.f32 %v2013_v14, %v558_v10  ;;  %v560_v19 = vld [vmem:[%s1999_s3 + $0xb08] sm:$0xff]  ;;  %v561_v21 = vld [vmem:[%s1999_s3 + $0xb10] sm:$0xff]  ;;  %v1013_v23 = vadd.f32 %v2016_v16, %v559_v17 }
 0x109   : > { %1391 = vst [vmem:[%s2048_s18 + $0xa50] sm:$0xff] %v991_v33  ;;  %1392 = vst [vmem:[%s2048_s18 + $0xa58] sm:$0xff] %v992_v37  ;;  %v1014_v25 = vadd.f32 %v2019_v18, %v560_v19  ;;  %v1015_v27 = vadd.f32 %v2022_v20, %v561_v21  ;;  %v562_v28 = vld [vmem:[%s1999_s3 + $0xb18] sm:$0xff]  ;;  %v563_v29 = vld [vmem:[%s1999_s3 + $0xb20] sm:$0xff] }
 0x10a   : > { %1393 = vst [vmem:[%s2048_s18 + $0xa60] sm:$0xff] %v993_v38  ;;  %1394 = vst [vmem:[%s2048_s18 + $0xa68] sm:$0xff] %v994_v39  ;;  %v564_v30 = vld [vmem:[%s1999_s3 + $0xb28] sm:$0xff]  ;;  %v1016_v31 = vadd.f32 %v2025_v22, %v562_v28  ;;  %v1017_v32 = vadd.f32 %v2028_v24, %v563_v29  ;;  %v565_v34 = vld [vmem:[%s1999_s3 + $0xb30] sm:$0xff] }
 0x10b   : > { %1395 = vst [vmem:[%s2048_s18 + $0xa70] sm:$0xff] %v995_v45  ;;  %1396 = vst [vmem:[%s2048_s18 + $0xa78] sm:$0xff] %v996_v46  ;;  %v1018_v33 = vadd.f32 %v2031_v26, %v564_v30  ;;  %v566_v35 = vld [vmem:[%s1999_s3 + $0xb38] sm:$0xff]  ;;  %v567_v36 = vld [vmem:[%s1999_s3 + $0xb40] sm:$0xff]  ;;  %v1019_v37 = vadd.f32 %v2054_v41, %v565_v34 }
 0x10c   : > { %1397 = vst [vmem:[%s2048_s18 + $0xa80] sm:$0xff] %v997_v47  ;;  %1398 = vst [vmem:[%s2048_s18 + $0xa88] sm:$0xff] %v998_v51  ;;  %v1020_v38 = vadd.f32 %v2056_v42, %v566_v35  ;;  %v1021_v39 = vadd.f32 %v2011_v13, %v567_v36  ;;  %v568_v40 = vld [vmem:[%s1999_s3 + $0xb48] sm:$0xff]  ;;  %v569_v43 = vld [vmem:[%s1999_s3 + $0xb50] sm:$0xff] }
 0x10d   : > { %1399 = vst [vmem:[%s2048_s18 + $0xa90] sm:$0xff] %v999_v52  ;;  %1400 = vst [vmem:[%s2048_s18 + $0xa98] sm:$0xff] %v1000_v53  ;;  %v570_v44 = vld [vmem:[%s1999_s3 + $0xb58] sm:$0xff]  ;;  %v1022_v45 = vadd.f32 %v2013_v14, %v568_v40  ;;  %v1023_v46 = vadd.f32 %v2016_v16, %v569_v43  ;;  %v571_v48 = vld [vmem:[%s1999_s3 + $0xb60] sm:$0xff] }
 0x10e   : > { %1401 = vst [vmem:[%s2048_s18 + $0xaa0] sm:$0xff] %v1001_v57  ;;  %1402 = vst [vmem:[%s2048_s18 + $0xaa8] sm:$0xff] %v1002_v58  ;;  %v1024_v47 = vadd.f32 %v2019_v18, %v570_v44  ;;  %v572_v49 = vld [vmem:[%s1999_s3 + $0xb68] sm:$0xff]  ;;  %v573_v50 = vld [vmem:[%s1999_s3 + $0xb70] sm:$0xff]  ;;  %v1025_v51 = vadd.f32 %v2022_v20, %v571_v48 }
 0x10f   : > { %1403 = vst [vmem:[%s2048_s18 + $0xab0] sm:$0xff] %v1003_v59  ;;  %1404 = vst [vmem:[%s2048_s18 + $0xab8] sm:$0xff] %v1004_v63  ;;  %v1026_v52 = vadd.f32 %v2025_v22, %v572_v49  ;;  %v1027_v53 = vadd.f32 %v2028_v24, %v573_v50  ;;  %v574_v54 = vld [vmem:[%s1999_s3 + $0xb78] sm:$0xff]  ;;  %v575_v55 = vld [vmem:[%s1999_s3 + $0xb80] sm:$0xff] }
 0x110   : > { %1405 = vst [vmem:[%s2048_s18 + $0xac0] sm:$0xff] %v1005_v0  ;;  %1406 = vst [vmem:[%s2048_s18 + $0xac8] sm:$0xff] %v1006_v1  ;;  %v576_v56 = vld [vmem:[%s1999_s3 + $0xb88] sm:$0xff]  ;;  %v1028_v57 = vadd.f32 %v2031_v26, %v574_v54  ;;  %v1029_v58 = vadd.f32 %v2054_v41, %v575_v55  ;;  %v577_v60 = vld [vmem:[%s1999_s3 + $0xb90] sm:$0xff] }
 0x111   : > { %1407 = vst [vmem:[%s2048_s18 + $0xad0] sm:$0xff] %v1007_v5  ;;  %1408 = vst [vmem:[%s2048_s18 + $0xad8] sm:$0xff] %v1008_v6  ;;  %v1030_v59 = vadd.f32 %v2056_v42, %v576_v56  ;;  %v578_v61 = vld [vmem:[%s1999_s3 + $0xb98] sm:$0xff]  ;;  %v579_v62 = vld [vmem:[%s1999_s3 + $0xba0] sm:$0xff]  ;;  %v1031_v63 = vadd.f32 %v2011_v13, %v577_v60 }
 0x112   : > { %1409 = vst [vmem:[%s2048_s18 + $0xae0] sm:$0xff] %v1009_v7  ;;  %1410 = vst [vmem:[%s2048_s18 + $0xae8] sm:$0xff] %v1010_v11  ;;  %v1032_v0 = vadd.f32 %v2013_v14, %v578_v61  ;;  %v1033_v1 = vadd.f32 %v2016_v16, %v579_v62  ;;  %v580_v2 = vld [vmem:[%s1999_s3 + $0xba8] sm:$0xff]  ;;  %v581_v3 = vld [vmem:[%s1999_s3 + $0xbb0] sm:$0xff] }
 0x113   : > { %1411 = vst [vmem:[%s2048_s18 + $0xaf0] sm:$0xff] %v1011_v12  ;;  %1412 = vst [vmem:[%s2048_s18 + $0xaf8] sm:$0xff] %v1012_v15  ;;  %v582_v4 = vld [vmem:[%s1999_s3 + $0xbb8] sm:$0xff]  ;;  %v1034_v5 = vadd.f32 %v2019_v18, %v580_v2  ;;  %v1035_v6 = vadd.f32 %v2022_v20, %v581_v3  ;;  %v583_v8 = vld [vmem:[%s1999_s3 + $0xbc0] sm:$0xff] }
 0x114   : > { %1413 = vst [vmem:[%s2048_s18 + $0xb00] sm:$0xff] %v1013_v23  ;;  %1414 = vst [vmem:[%s2048_s18 + $0xb08] sm:$0xff] %v1014_v25  ;;  %v1036_v7 = vadd.f32 %v2025_v22, %v582_v4  ;;  %v584_v9 = vld [vmem:[%s1999_s3 + $0xbc8] sm:$0xff]  ;;  %v585_v10 = vld [vmem:[%s1999_s3 + $0xbd0] sm:$0xff]  ;;  %v1037_v11 = vadd.f32 %v2028_v24, %v583_v8 }
 0x115   : > { %1415 = vst [vmem:[%s2048_s18 + $0xb10] sm:$0xff] %v1015_v27  ;;  %1416 = vst [vmem:[%s2048_s18 + $0xb18] sm:$0xff] %v1016_v31  ;;  %v1038_v12 = vadd.f32 %v2031_v26, %v584_v9  ;;  %v1039_v15 = vadd.f32 %v2054_v41, %v585_v10  ;;  %v586_v17 = vld [vmem:[%s1999_s3 + $0xbd8] sm:$0xff]  ;;  %v587_v19 = vld [vmem:[%s1999_s3 + $0xbe0] sm:$0xff] }
 0x116   : > { %1417 = vst [vmem:[%s2048_s18 + $0xb20] sm:$0xff] %v1017_v32  ;;  %1418 = vst [vmem:[%s2048_s18 + $0xb28] sm:$0xff] %v1018_v33  ;;  %v588_v21 = vld [vmem:[%s1999_s3 + $0xbe8] sm:$0xff]  ;;  %v1040_v23 = vadd.f32 %v2056_v42, %v586_v17  ;;  %v1041_v25 = vadd.f32 %v2011_v13, %v587_v19  ;;  %v589_v28 = vld [vmem:[%s1999_s3 + $0xbf0] sm:$0xff] }
 0x117   : > { %1419 = vst [vmem:[%s2048_s18 + $0xb30] sm:$0xff] %v1019_v37  ;;  %1420 = vst [vmem:[%s2048_s18 + $0xb38] sm:$0xff] %v1020_v38  ;;  %v1042_v27 = vadd.f32 %v2013_v14, %v588_v21  ;;  %v590_v29 = vld [vmem:[%s1999_s3 + $0xbf8] sm:$0xff]  ;;  %v591_v30 = vld [vmem:[%s1999_s3 + $0xc00] sm:$0xff]  ;;  %v1043_v31 = vadd.f32 %v2016_v16, %v589_v28 }
 0x118   : > { %1421 = vst [vmem:[%s2048_s18 + $0xb40] sm:$0xff] %v1021_v39  ;;  %1422 = vst [vmem:[%s2048_s18 + $0xb48] sm:$0xff] %v1022_v45  ;;  %v1044_v32 = vadd.f32 %v2019_v18, %v590_v29  ;;  %v1045_v33 = vadd.f32 %v2022_v20, %v591_v30  ;;  %v592_v34 = vld [vmem:[%s1999_s3 + $0xc08] sm:$0xff]  ;;  %v593_v35 = vld [vmem:[%s1999_s3 + $0xc10] sm:$0xff] }
 0x119   : > { %1423 = vst [vmem:[%s2048_s18 + $0xb50] sm:$0xff] %v1023_v46  ;;  %1424 = vst [vmem:[%s2048_s18 + $0xb58] sm:$0xff] %v1024_v47  ;;  %v594_v36 = vld [vmem:[%s1999_s3 + $0xc18] sm:$0xff]  ;;  %v1046_v37 = vadd.f32 %v2025_v22, %v592_v34  ;;  %v1047_v38 = vadd.f32 %v2028_v24, %v593_v35  ;;  %v595_v40 = vld [vmem:[%s1999_s3 + $0xc20] sm:$0xff] }
 0x11a   : > { %1425 = vst [vmem:[%s2048_s18 + $0xb60] sm:$0xff] %v1025_v51  ;;  %1426 = vst [vmem:[%s2048_s18 + $0xb68] sm:$0xff] %v1026_v52  ;;  %v1048_v39 = vadd.f32 %v2031_v26, %v594_v36  ;;  %v596_v43 = vld [vmem:[%s1999_s3 + $0xc28] sm:$0xff]  ;;  %v597_v44 = vld [vmem:[%s1999_s3 + $0xc30] sm:$0xff]  ;;  %v1049_v45 = vadd.f32 %v2054_v41, %v595_v40 }
 0x11b   : > { %1427 = vst [vmem:[%s2048_s18 + $0xb70] sm:$0xff] %v1027_v53  ;;  %1428 = vst [vmem:[%s2048_s18 + $0xb78] sm:$0xff] %v1028_v57  ;;  %v1050_v46 = vadd.f32 %v2056_v42, %v596_v43  ;;  %v1051_v47 = vadd.f32 %v2011_v13, %v597_v44  ;;  %v598_v48 = vld [vmem:[%s1999_s3 + $0xc38] sm:$0xff]  ;;  %v599_v49 = vld [vmem:[%s1999_s3 + $0xc40] sm:$0xff] }
 0x11c   : > { %1429 = vst [vmem:[%s2048_s18 + $0xb80] sm:$0xff] %v1029_v58  ;;  %1430 = vst [vmem:[%s2048_s18 + $0xb88] sm:$0xff] %v1030_v59  ;;  %v600_v50 = vld [vmem:[%s1999_s3 + $0xc48] sm:$0xff]  ;;  %v1052_v51 = vadd.f32 %v2013_v14, %v598_v48  ;;  %v1053_v52 = vadd.f32 %v2016_v16, %v599_v49  ;;  %v601_v13 = vld [vmem:[%s1999_s3 + $0xc50] sm:$0xff] }
 0x11d   : > { %1431 = vst [vmem:[%s2048_s18 + $0xb90] sm:$0xff] %v1031_v63  ;;  %1432 = vst [vmem:[%s2048_s18 + $0xb98] sm:$0xff] %v1032_v0  ;;  %v1054_v53 = vadd.f32 %v2019_v18, %v600_v50  ;;  %v602_v54 = vld [vmem:[%s1999_s3 + $0xc58] sm:$0xff]  ;;  %v603_v55 = vld [vmem:[%s1999_s3 + $0xc60] sm:$0xff]  ;;  %v1055_v56 = vadd.f32 %v2022_v20, %v601_v13 }
 0x11e   : > { %1433 = vst [vmem:[%s2048_s18 + $0xba0] sm:$0xff] %v1033_v1  ;;  %1434 = vst [vmem:[%s2048_s18 + $0xba8] sm:$0xff] %v1034_v5  ;;  %v1056_v14 = vadd.f32 %v2025_v22, %v602_v54  ;;  %v1057_v16 = vadd.f32 %v2028_v24, %v603_v55  ;;  %v604_v18 = vld [vmem:[%s1999_s3 + $0xc68] sm:$0xff]  ;;  %v605_v57 = vld [vmem:[%s1999_s3 + $0xc70] sm:$0xff] }
 0x11f   : > { %1435 = vst [vmem:[%s2048_s18 + $0xbb0] sm:$0xff] %v1035_v6  ;;  %1436 = vst [vmem:[%s2048_s18 + $0xbb8] sm:$0xff] %v1036_v7  ;;  %v606_v58 = vld [vmem:[%s1999_s3 + $0xc78] sm:$0xff]  ;;  %v1058_v20 = vadd.f32 %v2031_v26, %v604_v18  ;;  %v1059_v22 = vadd.f32 %v2054_v41, %v605_v57 }
 0x120   : > { %1437 = vst [vmem:[%s2048_s18 + $0xbc0] sm:$0xff] %v1037_v11  ;;  %1438 = vst [vmem:[%s2048_s18 + $0xbc8] sm:$0xff] %v1038_v12  ;;  %v1060_v24 = vadd.f32 %v2056_v42, %v606_v58 }
 0x121   : > { %1439 = vst [vmem:[%s2048_s18 + $0xbd0] sm:$0xff] %v1039_v15  ;;  %1440 = vst [vmem:[%s2048_s18 + $0xbd8] sm:$0xff] %v1040_v23 }
 0x122   : > { %1441 = vst [vmem:[%s2048_s18 + $0xbe0] sm:$0xff] %v1041_v25  ;;  %1442 = vst [vmem:[%s2048_s18 + $0xbe8] sm:$0xff] %v1042_v27 }
 0x123   : > { %1443 = vst [vmem:[%s2048_s18 + $0xbf0] sm:$0xff] %v1043_v31  ;;  %1444 = vst [vmem:[%s2048_s18 + $0xbf8] sm:$0xff] %v1044_v32 }
 0x124   : > { %1445 = vst [vmem:[%s2048_s18 + $0xc00] sm:$0xff] %v1045_v33  ;;  %1446 = vst [vmem:[%s2048_s18 + $0xc08] sm:$0xff] %v1046_v37 }
 0x125   : > { %1447 = vst [vmem:[%s2048_s18 + $0xc10] sm:$0xff] %v1047_v38  ;;  %1448 = vst [vmem:[%s2048_s18 + $0xc18] sm:$0xff] %v1048_v39 }
 0x126   : > { %1449 = vst [vmem:[%s2048_s18 + $0xc20] sm:$0xff] %v1049_v45  ;;  %1450 = vst [vmem:[%s2048_s18 + $0xc28] sm:$0xff] %v1050_v46 }
 0x127   : > { %1451 = vst [vmem:[%s2048_s18 + $0xc30] sm:$0xff] %v1051_v47  ;;  %1452 = vst [vmem:[%s2048_s18 + $0xc38] sm:$0xff] %v1052_v51 }
 0x128   : > { %1453 = vst [vmem:[%s2048_s18 + $0xc40] sm:$0xff] %v1053_v52  ;;  %1454 = vst [vmem:[%s2048_s18 + $0xc48] sm:$0xff] %v1054_v53 }
 0x129   : > { %1455 = vst [vmem:[%s2048_s18 + $0xc50] sm:$0xff] %v1055_v56  ;;  %1456 = vst [vmem:[%s2048_s18 + $0xc58] sm:$0xff] %v1056_v14 }
 0x12a   : > { %1457 = vst [vmem:[%s2048_s18 + $0xc60] sm:$0xff] %v1057_v16  ;;  %1458 = vst [vmem:[%s2048_s18 + $0xc68] sm:$0xff] %v1058_v20 }
 0x12b   : > { %1459 = vst [vmem:[%s2048_s18 + $0xc70] sm:$0xff] %v1059_v22  ;;  %1460 = vst [vmem:[%s2048_s18 + $0xc78] sm:$0xff] %v1060_v24 }
 0x12c   : > { %1742 = shalt.err (!%p1739_p7)
}
 0x12d   : > { %s1743_s27 = scalar_lea.hbm %s3228_s16, 51200  ;;  %s1747_s29 = scalar_lea.hbm %s3295_s2, 102400 }
 0x12e   : > { %p1744_p13 = scmp.ne.s32.totalorder %s3228_s16, %s1743_s27  ;;  %p1748_p12 = scmp.lt.u32.totalorder %s3228_s16, %s3295_s2 }
 0x12f   : > { %p1749_p4 = scmp.lt.u32.totalorder %s1747_s29, %s1743_s27  ;;  %p1751_p5 = scmp.lt.u32.totalorder %s1743_s27, %s3228_s16 }
 0x130   : > { %p1745_p2 = pnand %p1744_p13, %p3316_p10 }
 0x131   : > { %p1750_p8 = por %p1749_p4, %p1748_p12 }
 0x132   : > { %p1746_p6 = pneg %p1745_p2 }
 0x133   : > { %p1752_p11 = por %p1751_p5, %p1750_p8 }
 0x135   : > { %p1753_p1 = pnand %p1752_p11, %p1746_p6 }
 0x137   : > { %1756 = shalt.err (!%p1753_p1)
}
 0x138   : > { %s1822_s3 = smov 1280   ;;  %s1823_s18 = smov 80  }
 0x139   : > { %1598 = dma.vmem_to_hbm [thread:$0]  (%p3316_p10), %s3232_s23, 51200, %s3228_s16, %s1462_s12, %s1822_s3, %s1822_s3, %s1823_s18  }
 0x13a PF: > { %s1493_s20 = sand.u32 1, %s1795_s9   ;;  %p3317_p0 = scmp.ne.s32.totalorder %s3306_s22, 0 }
 0x13b   : > { %p3318_p9 = scmp.ge.s32.totalorder %s1815_s14, 2  ;;  %s1494_s26 = scalar_lea.sflag [#allocation4], %s1493_s20 }
 0x13d   : > { %p1609_p3 = pnand %p3318_p9, %p3317_p0 }
 0x13f   : > { %1790 = dma.done.wait (!%p1609_p3), %s1494_s26, 51200  }
 0x140   : > { %1792 = vsyncadd (!%p1609_p3), %s1494_s26, 4294916096  ;;  %s19_s14 = sadd.s32 1, %s1815_s14   ;;  %s3319_s9 = smov %s1799_s10 }
 0x141   : > { %p16_p7 = scmp.ge.s32.totalorder %s19_s14, 4   ;;  %s3320_s10 = smov %s1803_s11 }
 0x142   : > { %s3321_s11 = smov %s1953_s7  ;;  %s3322_s12 = smov %s1811_s13 }
 0x143   : > { %s3323_s13 = smov %s3325_s28  ;;  %18 = sbr.rel (!%p16_p7) target bundleno = 7 (0x7), region = 78 }
 0x14a   :  { %1499 = vsyncpa [#allocation3], 1 }
 0x14b   :  { %1501 = vsyncpa [#allocation3 + $0x1], 1 }
 0x14c   :  { %1502 = vsyncpa [#allocation6], 1 }
 0x14d   :  { %1503 = vsyncpa [#allocation4], 1 }
 0x14e   :  { %1505 = vsyncpa [#allocation4 + $0x1], 1 }

</bundles_post_ra>
